<compile_context>
chip_gen: v5e
topology: v5e:2x2
jax: 0.10.0
libtpu: 0.0.40
codegen_flags: <defaults>
</compile_context>

<pallas_src>
import functools

import jax
import jax.numpy as jnp
from jax import lax
from jax.experimental import pallas as pl
from jax.experimental.pallas import tpu as pltpu


_GAUSS_1D = (0.05, 0.25, 0.4, 0.25, 0.05)


def _replicate_pad2(val, pad_ref, H, W):
    """Write `val` (H, W) into pad_ref (H+4, W+4) with 2-pixel replicate padding."""
    Hp = H + 4
    # interior
    pad_ref[pl.ds(2, H), pl.ds(2, W)] = val
    # top / bottom rows (replicate first / last row)
    pad_ref[pl.ds(0, 2), pl.ds(2, W)] = jnp.broadcast_to(val[0:1, :], (2, W))
    pad_ref[pl.ds(2 + H, 2), pl.ds(2, W)] = jnp.broadcast_to(val[H - 1:H, :], (2, W))
    # left / right columns (replicate the already row-padded edge columns so that the
    # four corners get the correct nearest-pixel value)
    left_col = pad_ref[pl.ds(0, Hp), pl.ds(2, 1)]           # (Hp, 1)
    right_col = pad_ref[pl.ds(0, Hp), pl.ds(W + 1, 1)]      # (Hp, 1)
    pad_ref[pl.ds(0, Hp), pl.ds(0, 2)] = jnp.broadcast_to(left_col, (Hp, 2))
    pad_ref[pl.ds(0, Hp), pl.ds(2 + W, 2)] = jnp.broadcast_to(right_col, (Hp, 2))


def _gauss5_separable(pad_ref, H, W):
    """Separable 5x5 Gaussian on the padded (H+4, W+4) scratch -> (H, W) value."""
    # vertical taps: sublane-offset loads straight from the scratch ref
    acc = _GAUSS_1D[0] * pad_ref[pl.ds(0, H), :]
    for a in range(1, 5):
        acc = acc + _GAUSS_1D[a] * pad_ref[pl.ds(a, H), :]
    # horizontal taps: lane shifts on the in-register value
    out = _GAUSS_1D[0] * acc[:, 0:W]
    for b in range(1, 5):
        out = out + _GAUSS_1D[b] * acc[:, b:b + W]
    return out


def _edge_charbonnier_kernel(x_ref, y_ref, sum_ref, pad_ref, *, eps_sq):
    # x_ref / y_ref: (1, H, W) plane for this grid step; sum_ref: (1, 1) accumulator;
    # pad_ref: (H+4, W+4) VMEM scratch reused for every replicate-padded intermediate.
    g = pl.program_id(0)

    @pl.when(g == 0)
    def _():
        sum_ref[...] = jnp.zeros_like(sum_ref)

    H = x_ref.shape[1]
    W = x_ref.shape[2]

    # zero-stuffing mask: 4.0 at (even row, even col), 0 elsewhere
    ri = lax.broadcasted_iota(jnp.int32, (H, W), 0)
    ci = lax.broadcasted_iota(jnp.int32, (H, W), 1)
    even = jnp.logical_and((ri & 1) == 0, (ci & 1) == 0)
    mask4 = jnp.where(even, jnp.float32(4.0), jnp.float32(0.0))

    def laplacian(img):
        _replicate_pad2(img, pad_ref, H, W)
        filtered = _gauss5_separable(pad_ref, H, W)
        stuffed = filtered * mask4                 # == zeros.at[::2, ::2].set(4 * down)
        _replicate_pad2(stuffed, pad_ref, H, W)
        filtered2 = _gauss5_separable(pad_ref, H, W)
        return img - filtered2

    d = laplacian(x_ref[0]) - laplacian(y_ref[0])
    v = jnp.sqrt(d * d + eps_sq)
    row = jnp.sum(v, axis=1, keepdims=True)        # (H, 1)
    sum_ref[...] += jnp.sum(row, axis=0, keepdims=True)   # (1, 1)


def edge_loss(x_nchw, y_nchw, eps=1e-3):
    """Pallas EdgeLoss: Charbonnier loss between Laplacian residuals of x and y."""
    assert x_nchw.shape == y_nchw.shape, (x_nchw.shape, y_nchw.shape)
    B, C, H, W = x_nchw.shape
    G = B * C
    xf = x_nchw.reshape(G, H, W).astype(jnp.float32)
    yf = y_nchw.reshape(G, H, W).astype(jnp.float32)

    kern = functools.partial(_edge_charbonnier_kernel, eps_sq=float(eps) * float(eps))

    total = pl.pallas_call(
        kern,
        out_shape=jax.ShapeDtypeStruct((1, 1), jnp.float32),
        grid_spec=pltpu.PrefetchScalarGridSpec(
            num_scalar_prefetch=0,
            grid=(G,),
            in_specs=[
                pl.BlockSpec((1, H, W), lambda g: (g, 0, 0)),
                pl.BlockSpec((1, H, W), lambda g: (g, 0, 0)),
            ],
            out_specs=pl.BlockSpec((1, 1), lambda g: (0, 0)),
            scratch_shapes=[pltpu.VMEM((H + 4, W + 4), jnp.float32)],
        ),
        compiler_params=pltpu.CompilerParams(
            # output block is revisited (accumulator) -> the plane axis is "arbitrary"
            dimension_semantics=("arbitrary",),
        ),
        cost_estimate=pl.CostEstimate(
            flops=G * H * W * 100,
            transcendentals=G * H * W,
            bytes_accessed=2 * G * H * W * 4 + 4,
        ),
    )(xf, yf)

    return total[0, 0] / jnp.float32(G * H * W)


# ----------------------------------------------------------------------------
# Pure-JAX reference (mirrors the PyTorch module exactly) for in-script checking
# ----------------------------------------------------------------------------

def _edge_loss_ref(x, y, eps=1e-3):
    k1 = jnp.asarray(_GAUSS_1D, jnp.float32)
    k2 = jnp.outer(k1, k1)

    def conv_gauss(img):                                   # img: (B, C, H, W)
        H, W = img.shape[2], img.shape[3]
        p = jnp.pad(img, ((0, 0), (0, 0), (2, 2), (2, 2)), mode="edge")
        out = jnp.zeros_like(img)
        for a in range(5):
            for b in range(5):
                out = out + k2[a, b] * p[:, :, a:a + H, b:b + W]
        return out

    def laplacian(img):
        f = conv_gauss(img)
        nf = jnp.zeros_like(f)
        nf = nf.at[:, :, ::2, ::2].set(f[:, :, ::2, ::2] * 4.0)
        f2 = conv_gauss(nf)
        return img - f2

    d = laplacian(x) - laplacian(y)
    return jnp.mean(jnp.sqrt(d * d + eps * eps))


if __name__ == "__main__":
    key = jax.random.PRNGKey(0)
    kx, ky = jax.random.split(key)
    # Per-channel Gaussian-Laplacian (identical to the module for C=1; per-channel is
    # the depthwise intent for RGB inputs).
    B, C, H, W = 2, 3, 16, 16
    x = jax.random.normal(kx, (B, C, H, W), jnp.float32)
    y = jax.random.normal(ky, (B, C, H, W), jnp.float32)

    loss = jax.jit(edge_loss)(x, y)
    loss = jax.block_until_ready(loss)

    ref = _edge_loss_ref(x, y)
    assert loss.shape == ()
    assert bool(jnp.isfinite(loss))
    assert bool(jnp.allclose(loss, ref, rtol=1e-4, atol=1e-5)), (float(loss), float(ref))

    print("KERNEL_OK")
</pallas_src>

<mosaic_0001>
module attributes {stable_mosaic.version = 11 : i64} {
  func.func @_edge_charbonnier_kernel(%arg0: i32, %arg1: memref<1x16x16xf32, #tpu.memory_space<vmem>>, %arg2: memref<1x16x16xf32, #tpu.memory_space<vmem>>, %arg3: memref<1x1xf32, #tpu.memory_space<vmem>>, %arg4: memref<20x20xf32, #tpu.memory_space<vmem>>) attributes {dimension_semantics = [#tpu.dimension_semantics<arbitrary>], iteration_bounds = array<i64: 6>, scalar_prefetch = 0 : i64, scratch_operands = 1 : i64, tpu.core_type = #tpu.core_type<tc>, window_params = [{transform_indices = @transform_0, window_bounds = array<i64: 1, 16, 16>}, {transform_indices = @transform_1, window_bounds = array<i64: 1, 16, 16>}, {pipeline_mode = #tpu.pipeline_mode<synchronous>, transform_indices = @transform_2, window_bounds = array<i64: 1, 1>}]} {
    %c0_i32 = arith.constant 0 : i32
    %0 = arith.cmpi eq, %arg0, %c0_i32 : i32
    %1 = arith.extui %0 : i1 to i32
    %c0_i32_0 = arith.constant 0 : i32
    %2 = arith.cmpi ne, %1, %c0_i32_0 : i32
    scf.if %2 {
      %cst_147 = arith.constant 0.000000e+00 : f32
      %257 = vector.broadcast %cst_147 : f32 to vector<1x1xf32>
      %c0_148 = arith.constant 0 : index
      %c0_149 = arith.constant 0 : index
      %258 = vector.load %arg3[%c0_148, %c0_149] : memref<1x1xf32, #tpu.memory_space<vmem>>, vector<1x1xf32>
      tpu.vector_store %arg3[%c0_148, %c0_149], %257 {strides = array<i32>} : memref<1x1xf32, #tpu.memory_space<vmem>>, vector<1x1xf32>,
    } else {
    }
    %3 = tpu.iota {dimensions = array<i32: 0>} : vector<16x16xi32>
    %4 = tpu.iota {dimensions = array<i32: 1>} : vector<16x16xi32>
    %c1_i32 = arith.constant 1 : i32
    %5 = vector.broadcast %c1_i32 : i32 to vector<16x16xi32>
    %6 = arith.andi %3, %5 : vector<16x16xi32>
    %c0_i32_1 = arith.constant 0 : i32
    %7 = vector.broadcast %c0_i32_1 : i32 to vector<16x16xi32>
    %8 = arith.cmpi eq, %6, %7 : vector<16x16xi32>
    %c1_i32_2 = arith.constant 1 : i32
    %9 = vector.broadcast %c1_i32_2 : i32 to vector<16x16xi32>
    %10 = arith.andi %4, %9 : vector<16x16xi32>
    %c0_i32_3 = arith.constant 0 : i32
    %11 = vector.broadcast %c0_i32_3 : i32 to vector<16x16xi32>
    %12 = arith.cmpi eq, %10, %11 : vector<16x16xi32>
    %13 = arith.andi %8, %12 : vector<16x16xi1>
    %cst = arith.constant 4.000000e+00 : f32
    %cst_4 = arith.constant 0.000000e+00 : f32
    %14 = vector.broadcast %cst : f32 to vector<16x16xf32>
    %15 = vector.broadcast %cst_4 : f32 to vector<16x16xf32>
    %16 = arith.select %13, %14, %15 : vector<16x16xi1>, vector<16x16xf32>
    %c0 = arith.constant 0 : index
    %c0_5 = arith.constant 0 : index
    %c0_6 = arith.constant 0 : index
    %17 = vector.load %arg1[%c0, %c0_5, %c0_6] : memref<1x16x16xf32, #tpu.memory_space<vmem>>, vector<1x16x16xf32>
    %18 = vector.shape_cast %17 : vector<1x16x16xf32> to vector<16x16xf32>
    %c2 = arith.constant 2 : index
    %c2_7 = arith.constant 2 : index
    %19 = vector.load %arg4[%c2, %c2_7] : memref<20x20xf32, #tpu.memory_space<vmem>>, vector<16x16xf32>
    tpu.vector_store %arg4[%c2, %c2_7], %18 {strides = array<i32>} : memref<20x20xf32, #tpu.memory_space<vmem>>, vector<16x16xf32>,
    %20 = vector.extract_strided_slice %18 {offsets = [0, 0], sizes = [1, 16], strides = [1, 1]} : vector<16x16xf32> to vector<1x16xf32>
    %21 = vector.shape_cast %20 : vector<1x16xf32> to vector<1x16xf32>
    %22 = vector.broadcast %21 : vector<1x16xf32> to vector<2x16xf32>
    %c0_8 = arith.constant 0 : index
    %c2_9 = arith.constant 2 : index
    %23 = vector.load %arg4[%c0_8, %c2_9] : memref<20x20xf32, #tpu.memory_space<vmem>>, vector<2x16xf32>
    tpu.vector_store %arg4[%c0_8, %c2_9], %22 {strides = array<i32>} : memref<20x20xf32, #tpu.memory_space<vmem>>, vector<2x16xf32>,
    %24 = vector.extract_strided_slice %18 {offsets = [15, 0], sizes = [1, 16], strides = [1, 1]} : vector<16x16xf32> to vector<1x16xf32>
    %25 = vector.shape_cast %24 : vector<1x16xf32> to vector<1x16xf32>
    %26 = vector.broadcast %25 : vector<1x16xf32> to vector<2x16xf32>
    %c18 = arith.constant 18 : index
    %c2_10 = arith.constant 2 : index
    %27 = vector.load %arg4[%c18, %c2_10] : memref<20x20xf32, #tpu.memory_space<vmem>>, vector<2x16xf32>
    tpu.vector_store %arg4[%c18, %c2_10], %26 {strides = array<i32>} : memref<20x20xf32, #tpu.memory_space<vmem>>, vector<2x16xf32>,
    %c0_11 = arith.constant 0 : index
    %c2_12 = arith.constant 2 : index
    %28 = vector.load %arg4[%c0_11, %c2_12] : memref<20x20xf32, #tpu.memory_space<vmem>>, vector<20x1xf32>
    %c0_13 = arith.constant 0 : index
    %c17 = arith.constant 17 : index
    %29 = vector.load %arg4[%c0_13, %c17] : memref<20x20xf32, #tpu.memory_space<vmem>>, vector<20x1xf32>
    %30 = vector.shape_cast %28 : vector<20x1xf32> to vector<20x1xf32>
    %31 = vector.broadcast %30 : vector<20x1xf32> to vector<20x2xf32>
    %c0_14 = arith.constant 0 : index
    %c0_15 = arith.constant 0 : index
    %32 = vector.load %arg4[%c0_14, %c0_15] : memref<20x20xf32, #tpu.memory_space<vmem>>, vector<20x2xf32>
    tpu.vector_store %arg4[%c0_14, %c0_15], %31 {strides = array<i32>} : memref<20x20xf32, #tpu.memory_space<vmem>>, vector<20x2xf32>,
    %33 = vector.shape_cast %29 : vector<20x1xf32> to vector<20x1xf32>
    %34 = vector.broadcast %33 : vector<20x1xf32> to vector<20x2xf32>
    %c0_16 = arith.constant 0 : index
    %c18_17 = arith.constant 18 : index
    %35 = vector.load %arg4[%c0_16, %c18_17] : memref<20x20xf32, #tpu.memory_space<vmem>>, vector<20x2xf32>
    tpu.vector_store %arg4[%c0_16, %c18_17], %34 {strides = array<i32>} : memref<20x20xf32, #tpu.memory_space<vmem>>, vector<20x2xf32>,
    %c0_18 = arith.constant 0 : index
    %c0_19 = arith.constant 0 : index
    %36 = vector.load %arg4[%c0_18, %c0_19] : memref<20x20xf32, #tpu.memory_space<vmem>>, vector<16x20xf32>
    %cst_20 = arith.constant 5.000000e-02 : f32
    %37 = vector.broadcast %cst_20 : f32 to vector<16x20xf32>
    %38 = arith.mulf %37, %36 : vector<16x20xf32>
    %c1 = arith.constant 1 : index
    %c0_21 = arith.constant 0 : index
    %39 = vector.load %arg4[%c1, %c0_21] : memref<20x20xf32, #tpu.memory_space<vmem>>, vector<16x20xf32>
    %cst_22 = arith.constant 2.500000e-01 : f32
    %40 = vector.broadcast %cst_22 : f32 to vector<16x20xf32>
    %41 = arith.mulf %40, %39 : vector<16x20xf32>
    %42 = arith.addf %38, %41 : vector<16x20xf32>
    %c2_23 = arith.constant 2 : index
    %c0_24 = arith.constant 0 : index
    %43 = vector.load %arg4[%c2_23, %c0_24] : memref<20x20xf32, #tpu.memory_space<vmem>>, vector<16x20xf32>
    %cst_25 = arith.constant 4.000000e-01 : f32
    %44 = vector.broadcast %cst_25 : f32 to vector<16x20xf32>
    %45 = arith.mulf %44, %43 : vector<16x20xf32>
    %46 = arith.addf %42, %45 : vector<16x20xf32>
    %c3 = arith.constant 3 : index
    %c0_26 = arith.constant 0 : index
    %47 = vector.load %arg4[%c3, %c0_26] : memref<20x20xf32, #tpu.memory_space<vmem>>, vector<16x20xf32>
    %cst_27 = arith.constant 2.500000e-01 : f32
    %48 = vector.broadcast %cst_27 : f32 to vector<16x20xf32>
    %49 = arith.mulf %48, %47 : vector<16x20xf32>
    %50 = arith.addf %46, %49 : vector<16x20xf32>
    %c4 = arith.constant 4 : index
    %c0_28 = arith.constant 0 : index
    %51 = vector.load %arg4[%c4, %c0_28] : memref<20x20xf32, #tpu.memory_space<vmem>>, vector<16x20xf32>
    %cst_29 = arith.constant 5.000000e-02 : f32
    %52 = vector.broadcast %cst_29 : f32 to vector<16x20xf32>
    %53 = arith.mulf %52, %51 : vector<16x20xf32>
    %54 = arith.addf %50, %53 : vector<16x20xf32>
    %55 = vector.extract_strided_slice %54 {offsets = [0, 0], sizes = [16, 16], strides = [1, 1]} : vector<16x20xf32> to vector<16x16xf32>
    %cst_30 = arith.constant 5.000000e-02 : f32
    %56 = vector.broadcast %cst_30 : f32 to vector<16x16xf32>
    %57 = arith.mulf %56, %55 : vector<16x16xf32>
    %58 = vector.extract_strided_slice %54 {offsets = [0, 1], sizes = [16, 16], strides = [1, 1]} : vector<16x20xf32> to vector<16x16xf32>
    %cst_31 = arith.constant 2.500000e-01 : f32
    %59 = vector.broadcast %cst_31 : f32 to vector<16x16xf32>
    %60 = arith.mulf %59, %58 : vector<16x16xf32>
    %61 = arith.addf %57, %60 : vector<16x16xf32>
    %62 = vector.extract_strided_slice %54 {offsets = [0, 2], sizes = [16, 16], strides = [1, 1]} : vector<16x20xf32> to vector<16x16xf32>
    %cst_32 = arith.constant 4.000000e-01 : f32
    %63 = vector.broadcast %cst_32 : f32 to vector<16x16xf32>
    %64 = arith.mulf %63, %62 : vector<16x16xf32>
    %65 = arith.addf %61, %64 : vector<16x16xf32>
    %66 = vector.extract_strided_slice %54 {offsets = [0, 3], sizes = [16, 16], strides = [1, 1]} : vector<16x20xf32> to vector<16x16xf32>
    %cst_33 = arith.constant 2.500000e-01 : f32
    %67 = vector.broadcast %cst_33 : f32 to vector<16x16xf32>
    %68 = arith.mulf %67, %66 : vector<16x16xf32>
    %69 = arith.addf %65, %68 : vector<16x16xf32>
    %70 = vector.extract_strided_slice %54 {offsets = [0, 4], sizes = [16, 16], strides = [1, 1]} : vector<16x20xf32> to vector<16x16xf32>
    %cst_34 = arith.constant 5.000000e-02 : f32
    %71 = vector.broadcast %cst_34 : f32 to vector<16x16xf32>
    %72 = arith.mulf %71, %70 : vector<16x16xf32>
    %73 = arith.addf %69, %72 : vector<16x16xf32>
    %74 = arith.mulf %73, %16 : vector<16x16xf32>
    %c2_35 = arith.constant 2 : index
    %c2_36 = arith.constant 2 : index
    %75 = vector.load %arg4[%c2_35, %c2_36] : memref<20x20xf32, #tpu.memory_space<vmem>>, vector<16x16xf32>
    tpu.vector_store %arg4[%c2_35, %c2_36], %74 {strides = array<i32>} : memref<20x20xf32, #tpu.memory_space<vmem>>, vector<16x16xf32>,
    %76 = vector.extract_strided_slice %74 {offsets = [0, 0], sizes = [1, 16], strides = [1, 1]} : vector<16x16xf32> to vector<1x16xf32>
    %77 = vector.shape_cast %76 : vector<1x16xf32> to vector<1x16xf32>
    %78 = vector.broadcast %77 : vector<1x16xf32> to vector<2x16xf32>
    %c0_37 = arith.constant 0 : index
    %c2_38 = arith.constant 2 : index
    %79 = vector.load %arg4[%c0_37, %c2_38] : memref<20x20xf32, #tpu.memory_space<vmem>>, vector<2x16xf32>
    tpu.vector_store %arg4[%c0_37, %c2_38], %78 {strides = array<i32>} : memref<20x20xf32, #tpu.memory_space<vmem>>, vector<2x16xf32>,
    %80 = vector.extract_strided_slice %74 {offsets = [15, 0], sizes = [1, 16], strides = [1, 1]} : vector<16x16xf32> to vector<1x16xf32>
    %81 = vector.shape_cast %80 : vector<1x16xf32> to vector<1x16xf32>
    %82 = vector.broadcast %81 : vector<1x16xf32> to vector<2x16xf32>
    %c18_39 = arith.constant 18 : index
    %c2_40 = arith.constant 2 : index
    %83 = vector.load %arg4[%c18_39, %c2_40] : memref<20x20xf32, #tpu.memory_space<vmem>>, vector<2x16xf32>
    tpu.vector_store %arg4[%c18_39, %c2_40], %82 {strides = array<i32>} : memref<20x20xf32, #tpu.memory_space<vmem>>, vector<2x16xf32>,
    %c0_41 = arith.constant 0 : index
    %c2_42 = arith.constant 2 : index
    %84 = vector.load %arg4[%c0_41, %c2_42] : memref<20x20xf32, #tpu.memory_space<vmem>>, vector<20x1xf32>
    %c0_43 = arith.constant 0 : index
    %c17_44 = arith.constant 17 : index
    %85 = vector.load %arg4[%c0_43, %c17_44] : memref<20x20xf32, #tpu.memory_space<vmem>>, vector<20x1xf32>
    %86 = vector.shape_cast %84 : vector<20x1xf32> to vector<20x1xf32>
    %87 = vector.broadcast %86 : vector<20x1xf32> to vector<20x2xf32>
    %c0_45 = arith.constant 0 : index
    %c0_46 = arith.constant 0 : index
    %88 = vector.load %arg4[%c0_45, %c0_46] : memref<20x20xf32, #tpu.memory_space<vmem>>, vector<20x2xf32>
    tpu.vector_store %arg4[%c0_45, %c0_46], %87 {strides = array<i32>} : memref<20x20xf32, #tpu.memory_space<vmem>>, vector<20x2xf32>,
    %89 = vector.shape_cast %85 : vector<20x1xf32> to vector<20x1xf32>
    %90 = vector.broadcast %89 : vector<20x1xf32> to vector<20x2xf32>
    %c0_47 = arith.constant 0 : index
    %c18_48 = arith.constant 18 : index
    %91 = vector.load %arg4[%c0_47, %c18_48] : memref<20x20xf32, #tpu.memory_space<vmem>>, vector<20x2xf32>
    tpu.vector_store %arg4[%c0_47, %c18_48], %90 {strides = array<i32>} : memref<20x20xf32, #tpu.memory_space<vmem>>, vector<20x2xf32>,
    %c0_49 = arith.constant 0 : index
    %c0_50 = arith.constant 0 : index
    %92 = vector.load %arg4[%c0_49, %c0_50] : memref<20x20xf32, #tpu.memory_space<vmem>>, vector<16x20xf32>
    %cst_51 = arith.constant 5.000000e-02 : f32
    %93 = vector.broadcast %cst_51 : f32 to vector<16x20xf32>
    %94 = arith.mulf %93, %92 : vector<16x20xf32>
    %c1_52 = arith.constant 1 : index
    %c0_53 = arith.constant 0 : index
    %95 = vector.load %arg4[%c1_52, %c0_53] : memref<20x20xf32, #tpu.memory_space<vmem>>, vector<16x20xf32>
    %cst_54 = arith.constant 2.500000e-01 : f32
    %96 = vector.broadcast %cst_54 : f32 to vector<16x20xf32>
    %97 = arith.mulf %96, %95 : vector<16x20xf32>
    %98 = arith.addf %94, %97 : vector<16x20xf32>
    %c2_55 = arith.constant 2 : index
    %c0_56 = arith.constant 0 : index
    %99 = vector.load %arg4[%c2_55, %c0_56] : memref<20x20xf32, #tpu.memory_space<vmem>>, vector<16x20xf32>
    %cst_57 = arith.constant 4.000000e-01 : f32
    %100 = vector.broadcast %cst_57 : f32 to vector<16x20xf32>
    %101 = arith.mulf %100, %99 : vector<16x20xf32>
    %102 = arith.addf %98, %101 : vector<16x20xf32>
    %c3_58 = arith.constant 3 : index
    %c0_59 = arith.constant 0 : index
    %103 = vector.load %arg4[%c3_58, %c0_59] : memref<20x20xf32, #tpu.memory_space<vmem>>, vector<16x20xf32>
    %cst_60 = arith.constant 2.500000e-01 : f32
    %104 = vector.broadcast %cst_60 : f32 to vector<16x20xf32>
    %105 = arith.mulf %104, %103 : vector<16x20xf32>
    %106 = arith.addf %102, %105 : vector<16x20xf32>
    %c4_61 = arith.constant 4 : index
    %c0_62 = arith.constant 0 : index
    %107 = vector.load %arg4[%c4_61, %c0_62] : memref<20x20xf32, #tpu.memory_space<vmem>>, vector<16x20xf32>
    %cst_63 = arith.constant 5.000000e-02 : f32
    %108 = vector.broadcast %cst_63 : f32 to vector<16x20xf32>
    %109 = arith.mulf %108, %107 : vector<16x20xf32>
    %110 = arith.addf %106, %109 : vector<16x20xf32>
    %111 = vector.extract_strided_slice %110 {offsets = [0, 0], sizes = [16, 16], strides = [1, 1]} : vector<16x20xf32> to vector<16x16xf32>
    %cst_64 = arith.constant 5.000000e-02 : f32
    %112 = vector.broadcast %cst_64 : f32 to vector<16x16xf32>
    %113 = arith.mulf %112, %111 : vector<16x16xf32>
    %114 = vector.extract_strided_slice %110 {offsets = [0, 1], sizes = [16, 16], strides = [1, 1]} : vector<16x20xf32> to vector<16x16xf32>
    %cst_65 = arith.constant 2.500000e-01 : f32
    %115 = vector.broadcast %cst_65 : f32 to vector<16x16xf32>
    %116 = arith.mulf %115, %114 : vector<16x16xf32>
    %117 = arith.addf %113, %116 : vector<16x16xf32>
    %118 = vector.extract_strided_slice %110 {offsets = [0, 2], sizes = [16, 16], strides = [1, 1]} : vector<16x20xf32> to vector<16x16xf32>
    %cst_66 = arith.constant 4.000000e-01 : f32
    %119 = vector.broadcast %cst_66 : f32 to vector<16x16xf32>
    %120 = arith.mulf %119, %118 : vector<16x16xf32>
    %121 = arith.addf %117, %120 : vector<16x16xf32>
    %122 = vector.extract_strided_slice %110 {offsets = [0, 3], sizes = [16, 16], strides = [1, 1]} : vector<16x20xf32> to vector<16x16xf32>
    %cst_67 = arith.constant 2.500000e-01 : f32
    %123 = vector.broadcast %cst_67 : f32 to vector<16x16xf32>
    %124 = arith.mulf %123, %122 : vector<16x16xf32>
    %125 = arith.addf %121, %124 : vector<16x16xf32>
    %126 = vector.extract_strided_slice %110 {offsets = [0, 4], sizes = [16, 16], strides = [1, 1]} : vector<16x20xf32> to vector<16x16xf32>
    %cst_68 = arith.constant 5.000000e-02 : f32
    %127 = vector.broadcast %cst_68 : f32 to vector<16x16xf32>
    %128 = arith.mulf %127, %126 : vector<16x16xf32>
    %129 = arith.addf %125, %128 : vector<16x16xf32>
    %130 = arith.subf %18, %129 : vector<16x16xf32>
    %c0_69 = arith.constant 0 : index
    %c0_70 = arith.constant 0 : index
    %c0_71 = arith.constant 0 : index
    %131 = vector.load %arg2[%c0_69, %c0_70, %c0_71] : memref<1x16x16xf32, #tpu.memory_space<vmem>>, vector<1x16x16xf32>
    %132 = vector.shape_cast %131 : vector<1x16x16xf32> to vector<16x16xf32>
    %c2_72 = arith.constant 2 : index
    %c2_73 = arith.constant 2 : index
    %133 = vector.load %arg4[%c2_72, %c2_73] : memref<20x20xf32, #tpu.memory_space<vmem>>, vector<16x16xf32>
    tpu.vector_store %arg4[%c2_72, %c2_73], %132 {strides = array<i32>} : memref<20x20xf32, #tpu.memory_space<vmem>>, vector<16x16xf32>,
    %134 = vector.extract_strided_slice %132 {offsets = [0, 0], sizes = [1, 16], strides = [1, 1]} : vector<16x16xf32> to vector<1x16xf32>
    %135 = vector.shape_cast %134 : vector<1x16xf32> to vector<1x16xf32>
    %136 = vector.broadcast %135 : vector<1x16xf32> to vector<2x16xf32>
    %c0_74 = arith.constant 0 : index
    %c2_75 = arith.constant 2 : index
    %137 = vector.load %arg4[%c0_74, %c2_75] : memref<20x20xf32, #tpu.memory_space<vmem>>, vector<2x16xf32>
    tpu.vector_store %arg4[%c0_74, %c2_75], %136 {strides = array<i32>} : memref<20x20xf32, #tpu.memory_space<vmem>>, vector<2x16xf32>,
    %138 = vector.extract_strided_slice %132 {offsets = [15, 0], sizes = [1, 16], strides = [1, 1]} : vector<16x16xf32> to vector<1x16xf32>
    %139 = vector.shape_cast %138 : vector<1x16xf32> to vector<1x16xf32>
    %140 = vector.broadcast %139 : vector<1x16xf32> to vector<2x16xf32>
    %c18_76 = arith.constant 18 : index
    %c2_77 = arith.constant 2 : index
    %141 = vector.load %arg4[%c18_76, %c2_77] : memref<20x20xf32, #tpu.memory_space<vmem>>, vector<2x16xf32>
    tpu.vector_store %arg4[%c18_76, %c2_77], %140 {strides = array<i32>} : memref<20x20xf32, #tpu.memory_space<vmem>>, vector<2x16xf32>,
    %c0_78 = arith.constant 0 : index
    %c2_79 = arith.constant 2 : index
    %142 = vector.load %arg4[%c0_78, %c2_79] : memref<20x20xf32, #tpu.memory_space<vmem>>, vector<20x1xf32>
    %c0_80 = arith.constant 0 : index
    %c17_81 = arith.constant 17 : index
    %143 = vector.load %arg4[%c0_80, %c17_81] : memref<20x20xf32, #tpu.memory_space<vmem>>, vector<20x1xf32>
    %144 = vector.shape_cast %142 : vector<20x1xf32> to vector<20x1xf32>
    %145 = vector.broadcast %144 : vector<20x1xf32> to vector<20x2xf32>
    %c0_82 = arith.constant 0 : index
    %c0_83 = arith.constant 0 : index
    %146 = vector.load %arg4[%c0_82, %c0_83] : memref<20x20xf32, #tpu.memory_space<vmem>>, vector<20x2xf32>
    tpu.vector_store %arg4[%c0_82, %c0_83], %145 {strides = array<i32>} : memref<20x20xf32, #tpu.memory_space<vmem>>, vector<20x2xf32>,
    %147 = vector.shape_cast %143 : vector<20x1xf32> to vector<20x1xf32>
    %148 = vector.broadcast %147 : vector<20x1xf32> to vector<20x2xf32>
    %c0_84 = arith.constant 0 : index
    %c18_85 = arith.constant 18 : index
    %149 = vector.load %arg4[%c0_84, %c18_85] : memref<20x20xf32, #tpu.memory_space<vmem>>, vector<20x2xf32>
    tpu.vector_store %arg4[%c0_84, %c18_85], %148 {strides = array<i32>} : memref<20x20xf32, #tpu.memory_space<vmem>>, vector<20x2xf32>,
    %c0_86 = arith.constant 0 : index
    %c0_87 = arith.constant 0 : index
    %150 = vector.load %arg4[%c0_86, %c0_87] : memref<20x20xf32, #tpu.memory_space<vmem>>, vector<16x20xf32>
    %cst_88 = arith.constant 5.000000e-02 : f32
    %151 = vector.broadcast %cst_88 : f32 to vector<16x20xf32>
    %152 = arith.mulf %151, %150 : vector<16x20xf32>
    %c1_89 = arith.constant 1 : index
    %c0_90 = arith.constant 0 : index
    %153 = vector.load %arg4[%c1_89, %c0_90] : memref<20x20xf32, #tpu.memory_space<vmem>>, vector<16x20xf32>
    %cst_91 = arith.constant 2.500000e-01 : f32
    %154 = vector.broadcast %cst_91 : f32 to vector<16x20xf32>
    %155 = arith.mulf %154, %153 : vector<16x20xf32>
    %156 = arith.addf %152, %155 : vector<16x20xf32>
    %c2_92 = arith.constant 2 : index
    %c0_93 = arith.constant 0 : index
    %157 = vector.load %arg4[%c2_92, %c0_93] : memref<20x20xf32, #tpu.memory_space<vmem>>, vector<16x20xf32>
    %cst_94 = arith.constant 4.000000e-01 : f32
    %158 = vector.broadcast %cst_94 : f32 to vector<16x20xf32>
    %159 = arith.mulf %158, %157 : vector<16x20xf32>
    %160 = arith.addf %156, %159 : vector<16x20xf32>
    %c3_95 = arith.constant 3 : index
    %c0_96 = arith.constant 0 : index
    %161 = vector.load %arg4[%c3_95, %c0_96] : memref<20x20xf32, #tpu.memory_space<vmem>>, vector<16x20xf32>
    %cst_97 = arith.constant 2.500000e-01 : f32
    %162 = vector.broadcast %cst_97 : f32 to vector<16x20xf32>
    %163 = arith.mulf %162, %161 : vector<16x20xf32>
    %164 = arith.addf %160, %163 : vector<16x20xf32>
    %c4_98 = arith.constant 4 : index
    %c0_99 = arith.constant 0 : index
    %165 = vector.load %arg4[%c4_98, %c0_99] : memref<20x20xf32, #tpu.memory_space<vmem>>, vector<16x20xf32>
    %cst_100 = arith.constant 5.000000e-02 : f32
    %166 = vector.broadcast %cst_100 : f32 to vector<16x20xf32>
    %167 = arith.mulf %166, %165 : vector<16x20xf32>
    %168 = arith.addf %164, %167 : vector<16x20xf32>
    %169 = vector.extract_strided_slice %168 {offsets = [0, 0], sizes = [16, 16], strides = [1, 1]} : vector<16x20xf32> to vector<16x16xf32>
    %cst_101 = arith.constant 5.000000e-02 : f32
    %170 = vector.broadcast %cst_101 : f32 to vector<16x16xf32>
    %171 = arith.mulf %170, %169 : vector<16x16xf32>
    %172 = vector.extract_strided_slice %168 {offsets = [0, 1], sizes = [16, 16], strides = [1, 1]} : vector<16x20xf32> to vector<16x16xf32>
    %cst_102 = arith.constant 2.500000e-01 : f32
    %173 = vector.broadcast %cst_102 : f32 to vector<16x16xf32>
    %174 = arith.mulf %173, %172 : vector<16x16xf32>
    %175 = arith.addf %171, %174 : vector<16x16xf32>
    %176 = vector.extract_strided_slice %168 {offsets = [0, 2], sizes = [16, 16], strides = [1, 1]} : vector<16x20xf32> to vector<16x16xf32>
    %cst_103 = arith.constant 4.000000e-01 : f32
    %177 = vector.broadcast %cst_103 : f32 to vector<16x16xf32>
    %178 = arith.mulf %177, %176 : vector<16x16xf32>
    %179 = arith.addf %175, %178 : vector<16x16xf32>
    %180 = vector.extract_strided_slice %168 {offsets = [0, 3], sizes = [16, 16], strides = [1, 1]} : vector<16x20xf32> to vector<16x16xf32>
    %cst_104 = arith.constant 2.500000e-01 : f32
    %181 = vector.broadcast %cst_104 : f32 to vector<16x16xf32>
    %182 = arith.mulf %181, %180 : vector<16x16xf32>
    %183 = arith.addf %179, %182 : vector<16x16xf32>
    %184 = vector.extract_strided_slice %168 {offsets = [0, 4], sizes = [16, 16], strides = [1, 1]} : vector<16x20xf32> to vector<16x16xf32>
    %cst_105 = arith.constant 5.000000e-02 : f32
    %185 = vector.broadcast %cst_105 : f32 to vector<16x16xf32>
    %186 = arith.mulf %185, %184 : vector<16x16xf32>
    %187 = arith.addf %183, %186 : vector<16x16xf32>
    %188 = arith.mulf %187, %16 : vector<16x16xf32>
    %c2_106 = arith.constant 2 : index
    %c2_107 = arith.constant 2 : index
    %189 = vector.load %arg4[%c2_106, %c2_107] : memref<20x20xf32, #tpu.memory_space<vmem>>, vector<16x16xf32>
    tpu.vector_store %arg4[%c2_106, %c2_107], %188 {strides = array<i32>} : memref<20x20xf32, #tpu.memory_space<vmem>>, vector<16x16xf32>,
    %190 = vector.extract_strided_slice %188 {offsets = [0, 0], sizes = [1, 16], strides = [1, 1]} : vector<16x16xf32> to vector<1x16xf32>
    %191 = vector.shape_cast %190 : vector<1x16xf32> to vector<1x16xf32>
    %192 = vector.broadcast %191 : vector<1x16xf32> to vector<2x16xf32>
    %c0_108 = arith.constant 0 : index
    %c2_109 = arith.constant 2 : index
    %193 = vector.load %arg4[%c0_108, %c2_109] : memref<20x20xf32, #tpu.memory_space<vmem>>, vector<2x16xf32>
    tpu.vector_store %arg4[%c0_108, %c2_109], %192 {strides = array<i32>} : memref<20x20xf32, #tpu.memory_space<vmem>>, vector<2x16xf32>,
    %194 = vector.extract_strided_slice %188 {offsets = [15, 0], sizes = [1, 16], strides = [1, 1]} : vector<16x16xf32> to vector<1x16xf32>
    %195 = vector.shape_cast %194 : vector<1x16xf32> to vector<1x16xf32>
    %196 = vector.broadcast %195 : vector<1x16xf32> to vector<2x16xf32>
    %c18_110 = arith.constant 18 : index
    %c2_111 = arith.constant 2 : index
    %197 = vector.load %arg4[%c18_110, %c2_111] : memref<20x20xf32, #tpu.memory_space<vmem>>, vector<2x16xf32>
    tpu.vector_store %arg4[%c18_110, %c2_111], %196 {strides = array<i32>} : memref<20x20xf32, #tpu.memory_space<vmem>>, vector<2x16xf32>,
    %c0_112 = arith.constant 0 : index
    %c2_113 = arith.constant 2 : index
    %198 = vector.load %arg4[%c0_112, %c2_113] : memref<20x20xf32, #tpu.memory_space<vmem>>, vector<20x1xf32>
    %c0_114 = arith.constant 0 : index
    %c17_115 = arith.constant 17 : index
    %199 = vector.load %arg4[%c0_114, %c17_115] : memref<20x20xf32, #tpu.memory_space<vmem>>, vector<20x1xf32>
    %200 = vector.shape_cast %198 : vector<20x1xf32> to vector<20x1xf32>
    %201 = vector.broadcast %200 : vector<20x1xf32> to vector<20x2xf32>
    %c0_116 = arith.constant 0 : index
    %c0_117 = arith.constant 0 : index
    %202 = vector.load %arg4[%c0_116, %c0_117] : memref<20x20xf32, #tpu.memory_space<vmem>>, vector<20x2xf32>
    tpu.vector_store %arg4[%c0_116, %c0_117], %201 {strides = array<i32>} : memref<20x20xf32, #tpu.memory_space<vmem>>, vector<20x2xf32>,
    %203 = vector.shape_cast %199 : vector<20x1xf32> to vector<20x1xf32>
    %204 = vector.broadcast %203 : vector<20x1xf32> to vector<20x2xf32>
    %c0_118 = arith.constant 0 : index
    %c18_119 = arith.constant 18 : index
    %205 = vector.load %arg4[%c0_118, %c18_119] : memref<20x20xf32, #tpu.memory_space<vmem>>, vector<20x2xf32>
    tpu.vector_store %arg4[%c0_118, %c18_119], %204 {strides = array<i32>} : memref<20x20xf32, #tpu.memory_space<vmem>>, vector<20x2xf32>,
    %c0_120 = arith.constant 0 : index
    %c0_121 = arith.constant 0 : index
    %206 = vector.load %arg4[%c0_120, %c0_121] : memref<20x20xf32, #tpu.memory_space<vmem>>, vector<16x20xf32>
    %cst_122 = arith.constant 5.000000e-02 : f32
    %207 = vector.broadcast %cst_122 : f32 to vector<16x20xf32>
    %208 = arith.mulf %207, %206 : vector<16x20xf32>
    %c1_123 = arith.constant 1 : index
    %c0_124 = arith.constant 0 : index
    %209 = vector.load %arg4[%c1_123, %c0_124] : memref<20x20xf32, #tpu.memory_space<vmem>>, vector<16x20xf32>
    %cst_125 = arith.constant 2.500000e-01 : f32
    %210 = vector.broadcast %cst_125 : f32 to vector<16x20xf32>
    %211 = arith.mulf %210, %209 : vector<16x20xf32>
    %212 = arith.addf %208, %211 : vector<16x20xf32>
    %c2_126 = arith.constant 2 : index
    %c0_127 = arith.constant 0 : index
    %213 = vector.load %arg4[%c2_126, %c0_127] : memref<20x20xf32, #tpu.memory_space<vmem>>, vector<16x20xf32>
    %cst_128 = arith.constant 4.000000e-01 : f32
    %214 = vector.broadcast %cst_128 : f32 to vector<16x20xf32>
    %215 = arith.mulf %214, %213 : vector<16x20xf32>
    %216 = arith.addf %212, %215 : vector<16x20xf32>
    %c3_129 = arith.constant 3 : index
    %c0_130 = arith.constant 0 : index
    %217 = vector.load %arg4[%c3_129, %c0_130] : memref<20x20xf32, #tpu.memory_space<vmem>>, vector<16x20xf32>
    %cst_131 = arith.constant 2.500000e-01 : f32
    %218 = vector.broadcast %cst_131 : f32 to vector<16x20xf32>
    %219 = arith.mulf %218, %217 : vector<16x20xf32>
    %220 = arith.addf %216, %219 : vector<16x20xf32>
    %c4_132 = arith.constant 4 : index
    %c0_133 = arith.constant 0 : index
    %221 = vector.load %arg4[%c4_132, %c0_133] : memref<20x20xf32, #tpu.memory_space<vmem>>, vector<16x20xf32>
    %cst_134 = arith.constant 5.000000e-02 : f32
    %222 = vector.broadcast %cst_134 : f32 to vector<16x20xf32>
    %223 = arith.mulf %222, %221 : vector<16x20xf32>
    %224 = arith.addf %220, %223 : vector<16x20xf32>
    %225 = vector.extract_strided_slice %224 {offsets = [0, 0], sizes = [16, 16], strides = [1, 1]} : vector<16x20xf32> to vector<16x16xf32>
    %cst_135 = arith.constant 5.000000e-02 : f32
    %226 = vector.broadcast %cst_135 : f32 to vector<16x16xf32>
    %227 = arith.mulf %226, %225 : vector<16x16xf32>
    %228 = vector.extract_strided_slice %224 {offsets = [0, 1], sizes = [16, 16], strides = [1, 1]} : vector<16x20xf32> to vector<16x16xf32>
    %cst_136 = arith.constant 2.500000e-01 : f32
    %229 = vector.broadcast %cst_136 : f32 to vector<16x16xf32>
    %230 = arith.mulf %229, %228 : vector<16x16xf32>
    %231 = arith.addf %227, %230 : vector<16x16xf32>
    %232 = vector.extract_strided_slice %224 {offsets = [0, 2], sizes = [16, 16], strides = [1, 1]} : vector<16x20xf32> to vector<16x16xf32>
    %cst_137 = arith.constant 4.000000e-01 : f32
    %233 = vector.broadcast %cst_137 : f32 to vector<16x16xf32>
    %234 = arith.mulf %233, %232 : vector<16x16xf32>
    %235 = arith.addf %231, %234 : vector<16x16xf32>
    %236 = vector.extract_strided_slice %224 {offsets = [0, 3], sizes = [16, 16], strides = [1, 1]} : vector<16x20xf32> to vector<16x16xf32>
    %cst_138 = arith.constant 2.500000e-01 : f32
    %237 = vector.broadcast %cst_138 : f32 to vector<16x16xf32>
    %238 = arith.mulf %237, %236 : vector<16x16xf32>
    %239 = arith.addf %235, %238 : vector<16x16xf32>
    %240 = vector.extract_strided_slice %224 {offsets = [0, 4], sizes = [16, 16], strides = [1, 1]} : vector<16x20xf32> to vector<16x16xf32>
    %cst_139 = arith.constant 5.000000e-02 : f32
    %241 = vector.broadcast %cst_139 : f32 to vector<16x16xf32>
    %242 = arith.mulf %241, %240 : vector<16x16xf32>
    %243 = arith.addf %239, %242 : vector<16x16xf32>
    %244 = arith.subf %132, %243 : vector<16x16xf32>
    %245 = arith.subf %130, %244 : vector<16x16xf32>
    %246 = arith.mulf %245, %245 : vector<16x16xf32>
    %cst_140 = arith.constant 9.99999997E-7 : f32
    %247 = vector.broadcast %cst_140 : f32 to vector<16x16xf32>
    %248 = arith.addf %246, %247 : vector<16x16xf32>
    %249 = math.sqrt %248 : vector<16x16xf32>
    %cst_141 = arith.constant dense<0.000000e+00> : vector<16xf32>
    %250 = vector.multi_reduction <add>, %249, %cst_141 [1] : vector<16x16xf32> to vector<16xf32>
    %251 = vector.shape_cast %250 : vector<16xf32> to vector<16x1xf32>
    %c0_142 = arith.constant 0 : index
    %c0_143 = arith.constant 0 : index
    %252 = vector.load %arg3[%c0_142, %c0_143] : memref<1x1xf32, #tpu.memory_space<vmem>>, vector<1x1xf32>
    %cst_144 = arith.constant dense<0.000000e+00> : vector<1xf32>
    %253 = vector.multi_reduction <add>, %251, %cst_144 [0] : vector<16x1xf32> to vector<1xf32>
    %254 = vector.shape_cast %253 : vector<1xf32> to vector<1x1xf32>
    %255 = arith.addf %252, %254 : vector<1x1xf32>
    %c0_145 = arith.constant 0 : index
    %c0_146 = arith.constant 0 : index
    %256 = vector.load %arg3[%c0_145, %c0_146] : memref<1x1xf32, #tpu.memory_space<vmem>>, vector<1x1xf32>
    tpu.vector_store %arg3[%c0_145, %c0_146], %255 {strides = array<i32>} : memref<1x1xf32, #tpu.memory_space<vmem>>, vector<1x1xf32>,
    return
  }
  func.func @transform_0(%arg0: i32) -> (i32, i32, i32) {
    %c0_i32 = arith.constant 0 : i32
    %c0_i32_0 = arith.constant 0 : i32
    %c0_i32_1 = arith.constant 0 : i32
    return %arg0, %c0_i32, %c0_i32_0 : i32, i32, i32
  }
  func.func @transform_1(%arg0: i32) -> (i32, i32, i32) {
    %c0_i32 = arith.constant 0 : i32
    %c0_i32_0 = arith.constant 0 : i32
    %c0_i32_1 = arith.constant 0 : i32
    return %arg0, %c0_i32, %c0_i32_0 : i32, i32, i32
  }
  func.func @transform_2(%arg0: i32) -> (i32, i32) {
    %c0_i32 = arith.constant 0 : i32
    %c0_i32_0 = arith.constant 0 : i32
    %c0_i32_1 = arith.constant 0 : i32
    return %c0_i32, %c0_i32_0 : i32, i32
  }
}

</mosaic_0001>

<bundles_post_ra>
// kernel: edge_loss.1
= control target key start
LH: loop header
LB: loop body
LE: loop exit
PB: predicated region body
PF: predicated region fallthrough
CT: control target
= control target key end

     0   :  { %7 = vsyncpa [#allocation4], 0  ;;  %s1464_s0 = inlined_call_operand.hbm [shape: f32[6,16,16], index: 0, kind: input, shape index: {}]   ;;  %s1465_s1 = inlined_call_operand.hbm [shape: f32[6,16,16], index: 1, kind: input, shape index: {}]   ;;  %s1466_s2 = inlined_call_operand.hbm [shape: f32[1,1], index: 2, kind: output, shape index: {}]  }
   0x1   :  { %9 = vsyncpa [#allocation4 + $0x1], 0 }
   0x2   :  { %10 = vsyncpa [#allocation7], 0 }
   0x3   :  { %12 = vsyncpa [#allocation7 + $0x1], 0 }
   0x4   :  { %13 = vsyncpa [#allocation5], 0  ;;  %s1146_s9 = smov 0   ;;  %s1148_s10 = smov 0  }
   0x5   :  { %s1150_s11 = smov 0   ;;  %s1152_s12 = smov 0  }
   0x6 LB: > { %s1165_s13 = sadd.s32 4294967295, %s1117_s12   ;;  %s1168_s14 = sadd.s32 1, %s1117_s12   ;;  %s1117_s12 = sphi %s1152_s12, %s1476_s12   ;;  %s1113_s11 = sphi %s1150_s11, %s1475_s11   ;;  %s1109_s10 = sphi %s1148_s10, %s1474_s10   ;;  %s1105_s9 = sphi %s1146_s9, %s1473_s9  }
   0x7   : > { %s23_s15 = ssub.s32 %s1117_s12, %s1168_s14  ;;  %s26_s16 = sadd.s32 1, %s1113_s11 }
   0x8   : > { %p24_p0 = scmp.eq.s32.totalorder %s23_s15, 0  ;;  %p33_p1 = scmp.ne.s32.totalorder %s1113_s11, %s1109_s10 }
   0x9   : > { %p34_p2 = scmp.eq.s32.totalorder %s1117_s12, 0  ;;  %p39_p3 = scmp.ne.s32.totalorder %s1109_s10, %s1105_s9 }
   0xa   : > { %s1178_s17 = scalar_select %p24_p0, %s1113_s11, %s26_s16  }
   0xb   : > { %p1180_p4 = por %p34_p2, %p33_p1  ;;  %p40_p5 = scmp.eq.s32.totalorder %s1165_s13, 0 }
   0xc   : > { %p917_p6 = scmp.lt.s32.totalorder %s1117_s12, 6  ;;  %s1191_s20 = sand.u32 1, %s1113_s11  }
   0xd   : > { %p1186_p7 = por %p40_p5, %p39_p3  ;;  %s886_s21 = sshll.u32 %s1191_s20, 4 }
   0xe   : > { %s900_s22 = sshll.u32 %s1117_s12, 4  ;;  %s114_s26 = scalar_lea.vmem [#allocation3], %s886_s21 }
   0xf   : > { %s119_s25 = scalar_lea.hbm %s1464_s0, %s900_s22  ;;  %s122_s27 = sshll.u32 %s114_s26, 4  ;;  %s123_s27 = int_to_ptr.vmem [resolvable:$true] %s122_s27 }
  0x10   : > { %s120_s28 = sshll.u32 %s119_s25, 4  ;;  %p1204_p8 = pnand %p917_p6, %p1180_p4  ;;  %s121_s28 = int_to_ptr.hbm [resolvable:$true] %s120_s28 }
  0x11   : > { %p892_p9 = scmp.ge.s32.totalorder %s1117_s12, 1  ;;  %s111_s30 = scalar_lea.sflag [#allocation4], %s1191_s20 }
  0x12   : > { %s987_s3 = sshra.s32 %s121_s28, 4  ;;  %p991_p11 = pneg %p1204_p8  ;;  %s988_s3 = int_to_ptr.hbm [resolvable:$true] %s987_s3 }
  0x13   : > { %s989_s4 = scalar_lea.hbm %s988_s3, 16  ;;  %s994_s7 = scalar_lea.hbm %s1464_s0, 96 }
  0x14   : > { %p990_p10 = scmp.ne.s32.totalorder %s988_s3, %s989_s4  ;;  %p995_p0 = scmp.lt.s32.totalorder %s988_s3, %s1464_s0 }
  0x15   : > { %p996_p1 = scmp.lt.s32.totalorder %s994_s7, %s989_s4 }
  0x16   : > { %p992_p12 = pnand %p991_p11, %p990_p10 }
  0x17   : > { %p997_p2 = por %p996_p1, %p995_p0 }
  0x18   : > { %p993_p13 = pneg %p992_p12 }
  0x1a   : > { %p998_p3 = pnand %p997_p2, %p993_p13 }
  0x1c   : > { %1001 = shalt.err (!%p998_p3)
}
  0x1d   : > { %s1119_s15 = smov 128   ;;  %s1120_s16 = smov 8  }
  0x1e   : > { %913 = dma.hbm_to_vmem [thread:$0]  (!%p1204_p8), %s121_s28, 256, %s123_s27, %s111_s30, %s1119_s15, %s1119_s15, %s1120_s16  }
  0x1f   : > { %p152_p4 = scmp.lt.s32.totalorder %s1117_s12, 7  ;;  %s141_s24 = scalar_lea.hbm %s1465_s1, %s900_s22 }
  0x20   : > { %s142_s26 = sshll.u32 %s141_s24, 4  ;;  %s136_s3 = scalar_lea.vmem [#allocation6], %s886_s21  ;;  %s143_s26 = int_to_ptr.hbm [resolvable:$true] %s142_s26 }
  0x21   : > { %p1231_p5 = pnand %p892_p9, %p152_p4  ;;  %s144_s4 = sshll.u32 %s136_s3, 4  ;;  %s145_s4 = int_to_ptr.vmem [resolvable:$true] %s144_s4 }
  0x22   : > { %s133_s5 = scalar_lea.sflag [#allocation7], %s1191_s20  ;;  %s1017_s6 = sshra.s32 %s143_s26, 4  ;;  %s1018_s6 = int_to_ptr.hbm [resolvable:$true] %s1017_s6 }
  0x23   : > { %s1019_s27 = scalar_lea.hbm %s1018_s6, 16  ;;  %s1024_s28 = scalar_lea.hbm %s1465_s1, 96 }
  0x24   : > { %p1020_p6 = scmp.ne.s32.totalorder %s1018_s6, %s1019_s27  ;;  %p1025_p9 = scmp.lt.s32.totalorder %s1018_s6, %s1465_s1 }
  0x25   : > { %p1026_p13 = scmp.lt.s32.totalorder %s1024_s28, %s1019_s27 }
  0x26   : > { %p1022_p10 = pnand %p1020_p6, %p991_p11 }
  0x27   : > { %p1027_p0 = por %p1026_p13, %p1025_p9 }
  0x28   : > { %p1023_p12 = pneg %p1022_p10 }
  0x2a   : > { %p1028_p1 = pnand %p1027_p0, %p1023_p12 }
  0x2c   : > { %1031 = shalt.err (!%p1028_p1)
}
  0x2d   : > { %916 = dma.hbm_to_vmem [thread:$0]  (!%p1204_p8), %s143_s26, 256, %s145_s4, %s133_s5, %s1119_s15, %s1119_s15, %s1120_s16  }
  0x2e   : > { %156 = sbr.rel (%p1231_p5) target bundleno = 1590 (0x636), region = 28  ;;  %s158_s20 = sand.u32 (!%p1231_p5), 1, %s1109_s10  }
  0x2f   : > { %s893_s21 = sshll.u32 (!%p1231_p5), %s158_s20, 4  ;;  %s159_s8 = scalar_lea.sflag (!%p1231_p5), [#allocation4], %s158_s20 }
  0x30   : > { %s162_s9 = scalar_lea.vmem (!%p1231_p5), [#allocation3], %s893_s21 }
  0x33   : > { %1092 = dma.done.wait (%p1186_p7), %s159_s8, 256  }
  0x34   : > { %1094 = vsyncadd (%p1186_p7), %s159_s8, 4294967040  ;;  %s169_s18 = scalar_lea.sflag [#allocation7], %s158_s20  ;;  %s1256_s23 = scalar_lea.vmem [#allocation6], %s893_s21 }
  0x35   : > { %1096 = dma.done.wait (%p1186_p7), %s169_s18, 256  }
  0x36   : > { %1098 = vsyncadd (%p1186_p7), %s169_s18, 4294967040  ;;  %p895_p8 = scmp.ne.s32.totalorder %s1165_s13, 0 }
  0x38   : > { %197 = sbr.rel (%p895_p8) target bundleno = 63 (0x3f), region = 40 }
  0x3d   : > { %vm198_vm0 = vcmask 0   ;;  %v1121_v0 = vmov 0.0  }
  0x3e   : > { %199 = vst.msk [vmem:[#allocation8] sm:$0x1] %vm198_vm0, %v1121_v0 }
  0x3f PF: > { %v1263_v1 = vld [vmem:[%s162_s9] sm:$0xff]  ;;  %s1122_s29 = smov 2   ;;  %v1269_v3 = vld [vmem:[%s162_s9 + $0x8] sm:$0xff]  ;;  %v1123_v5 = vmov 17   ;;  %v1124_v6 = vmov 2   ;;  %vm225_vm1 = vcmask 146448   ;;  %v200_v55 = vlaneseq }
  0x40   : > { %219 = vrot.lane.b32.xlu0 %v1263_v1, %s1122_s29  ;;  %v228_v2 = vperm.slane %v1263_v1, 0  ;;  %v235_v4 = vperm.slane %v1269_v3, 7  ;;  %967 = vset.pattern.permute.xlu1 %v1123_v5  ;;  %vm233_vm2 = vcmask 140304   ;;  %vm259_vm3 = vcmask 15360   ;;  %s1125_s19 = smov 126   ;;  %s1126_s15 = smov 127  }
  0x41   : > { %964 = vset.pattern.permute.xlu2 %v1124_v6  ;;  %965 = vset.pattern.permute.xlu0 %v1124_v6  ;;  %vm276_vm4 = vcmask 162960   ;;  %vm262_vm5 = vcmask 11264   ;;  %vm279_vm6 = vcmask 158864   ;;  %s1127_s16 = smov 125   ;;  %s1128_s24 = smov 124   ;;  %v201_v56 = vshrl.u32 %v200_v55, 7 }
  0x42   : > { %230 = vrot.lane.b32.xlu1 %v228_v2, %s1122_s29  ;;  %v204_v57 = vand.u32 127, %v200_v55  ;;  %vm783_vm13 = vcmask 130048   ;;  %s1130_s25 = smov [#allocation8]   ;;  %s809_s5 = sshll.u32 %s1466_s2, 4  ;;  %s810_s5 = int_to_ptr.hbm [resolvable:$true] %s809_s5 }
  0x43   : > { %v205_v60 = vand.u32 1, %v201_v56  ;;  %v202_v62 = vadd.s32 8, %v201_v56  ;;  %s807_s26 = sshll.u32 %s1130_s25, 4  ;;  %p918_p7 = scmp.eq.s32.totalorder %s1165_s13, 5  ;;  %s808_s26 = int_to_ptr.vmem [resolvable:$true] %s807_s26 }
  0x44   : > { %v209_v61 = vand.u32 1, %v204_v57 }
  0x45   : > { %vm207_vm7 = vcmp.eq.s32.totalorder %v205_v60, 0 }
  0x46   : > { %vm1299_vm8 = vcmp.eq.s32.totalorder %v209_v61, 0 }
  0x47   : > { %vm211_vm9 = vmand %vm207_vm7, %vm1299_vm8 }
  0x48   : > { %221 = vrot.lane.b32.xlu0 %v1269_v3, %s1122_s29 }
  0x4a   : > { %237 = vrot.lane.b32.xlu1 %v235_v4, %s1122_s29  ;;  %v206_v4 = vand.u32 1, %v202_v62 }
  0x4c   : > { %vm208_vm10 = vcmp.eq.s32.totalorder %v206_v4, 0 }
  0x4d   : > { %vm212_vm11 = vmand %vm208_vm10, %vm1299_vm8 }
  0xb2   : > { %v220_v7 = vpop.permute.xlu0 %219 }
  0xb3   : > { %226 = vst.msk [vmem:[#allocation2 + $0x2] sm:$0xff] %vm225_vm1, %v220_v7 }
  0xb4   : > { %v231_v8 = vpop.permute.xlu1 %230 }
  0xb5   : > { %234 = vst.msk [vmem:[#allocation2] sm:$0x3] %vm233_vm2, %v231_v8 }
  0xba   : > { %v222_v9 = vpop.permute.xlu0 %221 }
  0xbb   : > { %227 = vst.msk [vmem:[#allocation2 + $0xa] sm:$0xff] %vm225_vm1, %v222_v9 }
  0xbc   : > { %v238_v10 = vpop.permute.xlu1 %237  ;;  %v241_v11 = vld [vmem:[#allocation2] sm:$0xff] }
  0xbd   : > { %240 = vst.msk [vmem:[#allocation2 + $0x12] sm:$0x3] %vm233_vm2, %v238_v10  ;;  %265 = vperm.xlu1 %967, %v241_v11  }
  0xc2   : > { %v242_v12 = vld [vmem:[#allocation2 + $0x8] sm:$0xff] }
  0xc3   : > { %251 = vperm.xlu2 %964, %v242_v12  }
  0xc4   : > { %v243_v13 = vld [vmem:[#allocation2 + $0x10] sm:$0xf] }
  0xc5   : > { %273 = vperm.xlu1 %967, %v243_v13   ;;  %256 = vperm.xlu0 %965, %v243_v13  }
  0xcb   : > { %246 = vperm.xlu2 %964, %v241_v11  }
  0xcd   : > { %970 = vset.pattern.permute.xlu1 %v1124_v6 }
  0xd3   : > { %966 = vset.pattern.permute.xlu2 %v1123_v5 }
  0xd4   : > { %269 = vperm.xlu2 %966, %v242_v12   ;;  %v1129_v12 = vmov 0.0  }
  0xd5   : > { %v1305_v13 = vsel %vm211_vm9, 4.0, %v1129_v12 }
  0xdc   : > { %969 = vset.pattern.permute.xlu2 %v1124_v6 }
 0x11d   : > { %v252_v14 = vpop.permute.xlu2 %251 }
 0x11e   : > { %261 = vst.msk [vmem:[#allocation2 + $0x8] sm:$0xff] %vm259_vm3, %v252_v14 }
 0x125   : > { %v247_v15 = vpop.permute.xlu2 %246 }
 0x126   : > { %260 = vst.msk [vmem:[#allocation2] sm:$0xff] %vm259_vm3, %v247_v15 }
 0x12e   : > { %v270_v16 = vpop.permute.xlu2 %269 }
 0x12f   : > { %278 = vst.msk [vmem:[#allocation2 + $0x8] sm:$0xff] %vm276_vm4, %v270_v16  ;;  %v266_v17 = vpop.permute.xlu1 %265 }
 0x130   : > { %277 = vst.msk [vmem:[#allocation2] sm:$0xff] %vm276_vm4, %v266_v17 }
 0x136   : > { %v282_v31 = vld [vmem:[#allocation2 + $0x8] sm:$0xff] }
 0x137   : > { %v285_v18 = vld [vmem:[#allocation2 + $0x1] sm:$0xff]  ;;  %v257_v19 = vpop.permute.xlu0 %256  ;;  %v274_v20 = vpop.permute.xlu1 %273  ;;  %v284_v36 = vmul.f32 0.05, %v282_v31 }
 0x138   : > { %263 = vst.msk [vmem:[#allocation2 + $0x10] sm:$0xf] %vm262_vm5, %v257_v19  ;;  %v281_v21 = vld [vmem:[#allocation2] sm:$0xff]  ;;  %v287_v22 = vmul.f32 0.25, %v285_v18 }
 0x139   : > { %v291_v23 = vld [vmem:[#allocation2 + $0x2] sm:$0xff]  ;;  %280 = vst.msk [vmem:[#allocation2 + $0x10] sm:$0xf] %vm279_vm6, %v274_v20  ;;  %v283_v24 = vmul.f32 0.05, %v281_v21  ;;  %v1311_v21 = vsel %vm212_vm11, 4.0, %v1129_v12 }
 0x13a   : > { %v297_v25 = vld [vmem:[#allocation2 + $0x3] sm:$0xff]  ;;  %v293_v27 = vmul.f32 0.4, %v291_v23 }
 0x13b   : > { %v289_v26 = vadd.f32 %v287_v22, %v283_v24  ;;  %v303_v28 = vld [vmem:[#allocation2 + $0x4] sm:$0xff]  ;;  %v299_v30 = vmul.f32 0.25, %v297_v25 }
 0x13c   : > { %v305_v33 = vmul.f32 0.05, %v303_v28  ;;  %v1318_v25 = vld [vmem:[%s1256_s23] sm:$0xff] }
 0x13d   : > { %v295_v29 = vadd.f32 %v293_v27, %v289_v26 }
 0x13f   : > { %v301_v32 = vadd.f32 %v299_v30, %v295_v29 }
 0x140   : > { %v286_v34 = vld [vmem:[#allocation2 + $0x9] sm:$0xff] }
 0x141   : > { %v307_v35 = vadd.f32 %v305_v33, %v301_v32  ;;  %v288_v37 = vmul.f32 0.25, %v286_v34  ;;  %v292_v38 = vld [vmem:[#allocation2 + $0xa] sm:$0xff] }
 0x142   : > { %v298_v39 = vld [vmem:[#allocation2 + $0xb] sm:$0xff]  ;;  %v294_v43 = vmul.f32 0.4, %v292_v38 }
 0x143   : > { %v323_v40 = vmul.f32 0.4, %v307_v35  ;;  %v311_v41 = vmul.f32 0.25, %v307_v35  ;;  %v290_v42 = vadd.f32 %v288_v37, %v284_v36  ;;  %v304_v44 = vld [vmem:[#allocation2 + $0xc] sm:$0xff]  ;;  %v300_v46 = vmul.f32 0.25, %v298_v39 }
 0x144   : > { %v306_v48 = vmul.f32 0.05, %v304_v44  ;;  %v309_v52 = vmul.f32 0.05, %v307_v35  ;;  %v1329_v33 = vld [vmem:[%s1256_s23 + $0x8] sm:$0xff]  ;;  %v499_v35 = vperm.slane %v1318_v25, 0 }
 0x145   : > { %327 = vrot.lane.b32.xlu1 %v323_v40, %s1125_s19  ;;  %315 = vrot.lane.b32.xlu2 %v311_v41, %s1126_s15  ;;  %v296_v45 = vadd.f32 %v294_v43, %v290_v42  ;;  %v505_v34 = vperm.slane %v1329_v33, 7 }
 0x147   : > { %v302_v47 = vadd.f32 %v300_v46, %v296_v45 }
 0x149   : > { %v308_v49 = vadd.f32 %v306_v48, %v302_v47 }
 0x14b   : > { %v324_v50 = vmul.f32 0.4, %v308_v49  ;;  %v312_v51 = vmul.f32 0.25, %v308_v49  ;;  %v310_v53 = vmul.f32 0.05, %v308_v49 }
 0x14d   : > { %329 = vrot.lane.b32.xlu2 %v324_v50, %s1125_s19  ;;  %337 = vrot.lane.b32.xlu1 %v312_v51, %s1127_s16 }
 0x14e   : > { %317 = vrot.lane.b32.xlu0 %v312_v51, %s1126_s15 }
 0x155   : > { %345 = vrot.lane.b32.xlu2 %v309_v52, %s1128_s24 }
 0x156   : > { %335 = vrot.lane.b32.xlu0 %v311_v41, %s1127_s16 }
 0x15e   : > { %347 = vrot.lane.b32.xlu0 %v310_v53, %s1128_s24 }
 0x19f   : > { %v316_v54 = vpop.permute.xlu2 %315 }
 0x1a0   : > { %v321_v2 = vadd.f32 %v316_v54, %v309_v52 }
 0x1a7   : > { %v330_v58 = vpop.permute.xlu2 %329 }
 0x1af   : > { %v346_v11 = vpop.permute.xlu2 %345 }
 0x1b7   : > { %v328_v63 = vpop.permute.xlu1 %327 }
 0x1b8   : > { %v333_v7 = vadd.f32 %v328_v63, %v321_v2 }
 0x1bf   : > { %v338_v17 = vpop.permute.xlu1 %337 }
 0x1c0   : > { %v318_v59 = vpop.permute.xlu0 %317 }
 0x1c1   : > { %v322_v8 = vadd.f32 %v318_v59, %v310_v53 }
 0x1c3   : > { %v334_v14 = vadd.f32 %v330_v58, %v322_v8 }
 0x1c5   : > { %v342_v18 = vadd.f32 %v338_v17, %v334_v14 }
 0x1c8   : > { %v336_v9 = vpop.permute.xlu0 %335 }
 0x1c9   : > { %v341_v10 = vadd.f32 %v336_v9, %v333_v7 }
 0x1cb   : > { %v351_v15 = vadd.f32 %v346_v11, %v341_v10 }
 0x1cd   : > { %v353_v16 = vmul.f32 %v351_v15, %v1305_v13 }
 0x1cf   : > { %357 = vrot.lane.b32.xlu1 %v353_v16, %s1122_s29  ;;  %v365_v19 = vperm.slane %v353_v16, 0 }
 0x1d0   : > { %v348_v20 = vpop.permute.xlu0 %347 }
 0x1d1   : > { %v352_v22 = vadd.f32 %v348_v20, %v342_v18  ;;  %367 = vrot.lane.b32.xlu0 %v365_v19, %s1122_s29 }
 0x1d3   : > { %v354_v23 = vmul.f32 %v352_v22, %v1311_v21 }
 0x1d5   : > { %359 = vrot.lane.b32.xlu2 %v354_v23, %s1122_s29  ;;  %v371_v24 = vperm.slane %v354_v23, 7 }
 0x1d7   : > { %373 = vrot.lane.b32.xlu1 %v371_v24, %s1122_s29 }
 0x1dd   : > { %491 = vrot.lane.b32.xlu2 %v1318_v25, %s1122_s29 }
 0x22f   : > { %v360_v26 = vpop.permute.xlu2 %359 }
 0x230   : > { %364 = vst.msk [vmem:[#allocation2 + $0xa] sm:$0xff] %vm225_vm1, %v360_v26 }
 0x237   : > { %v492_v36 = vpop.permute.xlu2 %491 }
 0x241   : > { %v358_v27 = vpop.permute.xlu1 %357 }
 0x242   : > { %363 = vst.msk [vmem:[#allocation2 + $0x2] sm:$0xff] %vm225_vm1, %v358_v27 }
 0x243   : > { %v368_v28 = vpop.permute.xlu0 %367 }
 0x244   : > { %370 = vst.msk [vmem:[#allocation2] sm:$0x3] %vm233_vm2, %v368_v28 }
 0x249   : > { %v374_v29 = vpop.permute.xlu1 %373  ;;  %v378_v30 = vld [vmem:[#allocation2 + $0x8] sm:$0xff] }
 0x24a   : > { %376 = vst.msk [vmem:[#allocation2 + $0x12] sm:$0x3] %vm233_vm2, %v374_v29  ;;  %387 = vperm.xlu0 %965, %v378_v30  }
 0x24b   : > { %v377_v31 = vld [vmem:[#allocation2] sm:$0xff] }
 0x24c   : > { %382 = vperm.xlu2 %969, %v377_v31  }
 0x251   : > { %v379_v32 = vld [vmem:[#allocation2 + $0x10] sm:$0xf] }
 0x252   : > { %968 = vset.pattern.permute.xlu0 %v1123_v5  ;;  %392 = vperm.xlu1 %970, %v379_v32  }
 0x253   : > { %403 = vperm.xlu0 %968, %v378_v30  }
 0x254   : > { %971 = vset.pattern.permute.xlu2 %v1123_v5 }
 0x255   : > { %399 = vperm.xlu2 %971, %v377_v31  }
 0x25a   : > { %972 = vset.pattern.permute.xlu1 %v1123_v5 }
 0x25b   : > { %407 = vperm.xlu1 %972, %v379_v32   ;;  %507 = vrot.lane.b32.xlu0 %v505_v34, %s1122_s29 }
 0x25c   : > { %975 = vset.pattern.permute.xlu0 %v1124_v6 }
 0x25d   : > { %501 = vrot.lane.b32.xlu2 %v499_v35, %s1122_s29 }
 0x25e   : > { %974 = vset.pattern.permute.xlu2 %v1124_v6 }
 0x263   : > { %493 = vrot.lane.b32.xlu1 %v1329_v33, %s1122_s29 }
 0x264   : > { %973 = vset.pattern.permute.xlu1 %v1124_v6 }
 0x2a6   : > { %v383_v37 = vpop.permute.xlu2 %382 }
 0x2a7   : > { %395 = vst.msk [vmem:[#allocation2] sm:$0xff] %vm259_vm3, %v383_v37 }
 0x2af   : > { %v400_v38 = vpop.permute.xlu2 %399 }
 0x2b0   : > { %410 = vst.msk [vmem:[#allocation2] sm:$0xff] %vm276_vm4, %v400_v38 }
 0x2b7   : > { %v502_v42 = vpop.permute.xlu2 %501  ;;  %v1347_v44 = vld [vmem:[#allocation2] sm:$0xff] }
 0x2bc   : > { %v388_v39 = vpop.permute.xlu0 %387 }
 0x2bd   : > { %396 = vst.msk [vmem:[#allocation2 + $0x8] sm:$0xff] %vm259_vm3, %v388_v39 }
 0x2c4   : > { %v393_v40 = vpop.permute.xlu1 %392 }
 0x2c5   : > { %397 = vst.msk [vmem:[#allocation2 + $0x10] sm:$0xf] %vm262_vm5, %v393_v40  ;;  %v404_v41 = vpop.permute.xlu0 %403 }
 0x2c6   : > { %411 = vst.msk [vmem:[#allocation2 + $0x8] sm:$0xff] %vm276_vm4, %v404_v41 }
 0x2cd   : > { %v408_v43 = vpop.permute.xlu1 %407  ;;  %v1349_v45 = vld [vmem:[#allocation2 + $0x1] sm:$0xff]  ;;  %v508_v54 = vpop.permute.xlu0 %507 }
 0x2ce   : > { %412 = vst.msk [vmem:[#allocation2 + $0x10] sm:$0xf] %vm279_vm6, %v408_v43  ;;  %v1352_v46 = vld [vmem:[#allocation2 + $0x8] sm:$0xff] }
 0x2cf   : > { %504 = vst.msk [vmem:[#allocation2] sm:$0x3] %vm233_vm2, %v502_v42  ;;  %v1354_v47 = vld [vmem:[#allocation2 + $0x2] sm:$0xff] }
 0x2d0   : > { %v1356_v48 = vld [vmem:[#allocation2 + $0x3] sm:$0xff] }
 0x2d1   : > { %v1358_v49 = vld [vmem:[#allocation2 + $0x4] sm:$0xff] }
 0x2d5   : > { %v1360_v50 = vld [vmem:[#allocation2 + $0x9] sm:$0xff]  ;;  %v494_v53 = vpop.permute.xlu1 %493 }
 0x2d6   : > { %v1362_v51 = vld [vmem:[#allocation2 + $0xa] sm:$0xff]  ;;  %497 = vst.msk [vmem:[#allocation2 + $0x2] sm:$0xff] %vm225_vm1, %v492_v36 }
 0x2d7   : > { %v1364_v52 = vld [vmem:[#allocation2 + $0xb] sm:$0xff] }
 0x2d8   : > { %v1366_v55 = vld [vmem:[#allocation2 + $0xc] sm:$0xff] }
 0x2d9   : > { %498 = vst.msk [vmem:[#allocation2 + $0xa] sm:$0xff] %vm225_vm1, %v494_v53 }
 0x2da   : > { %510 = vst.msk [vmem:[#allocation2 + $0x12] sm:$0x3] %vm233_vm2, %v508_v54 }
 0x2dd   : > { %v511_v56 = vld [vmem:[#allocation2] sm:$0xff] }
 0x2de   : > { %516 = vperm.xlu1 %973, %v511_v56  }
 0x2e0   : > { %v512_v57 = vld [vmem:[#allocation2 + $0x8] sm:$0xff] }
 0x2e1   : > { %521 = vperm.xlu2 %974, %v512_v57   ;;  %v513_v58 = vld [vmem:[#allocation2 + $0x10] sm:$0xf] }
 0x2e2   : > { %526 = vperm.xlu0 %975, %v513_v58  }
 0x2e6   : > { %976 = vset.pattern.permute.xlu1 %v1123_v5 }
 0x2e7   : > { %533 = vperm.xlu1 %976, %v511_v56  }
 0x2e9   : > { %977 = vset.pattern.permute.xlu2 %v1123_v5 }
 0x2ea   : > { %537 = vperm.xlu2 %977, %v512_v57  }
 0x2ef   : > { %541 = vperm.xlu1 %976, %v513_v58  }
 0x2f2   : > { %978 = vset.pattern.permute.xlu2 %v1124_v6 }
 0x2f7   : > { %979 = vset.pattern.permute.xlu1 %v1124_v6 }
 0x33b   : > { %v522_v59 = vpop.permute.xlu2 %521 }
 0x33c   : > { %530 = vst.msk [vmem:[#allocation2 + $0x8] sm:$0xff] %vm259_vm3, %v522_v59 }
 0x344   : > { %v538_v60 = vpop.permute.xlu2 %537 }
 0x345   : > { %545 = vst.msk [vmem:[#allocation2 + $0x8] sm:$0xff] %vm276_vm4, %v538_v60 }
 0x34c   : > { %v548_v16 = vld [vmem:[#allocation2 + $0x8] sm:$0xff] }
 0x34d   : > { %v550_v23 = vmul.f32 0.05, %v548_v16 }
 0x350   : > { %v517_v61 = vpop.permute.xlu1 %516 }
 0x351   : > { %529 = vst.msk [vmem:[#allocation2] sm:$0xff] %vm259_vm3, %v517_v61 }
 0x354   : > { %v527_v62 = vpop.permute.xlu0 %526 }
 0x355   : > { %531 = vst.msk [vmem:[#allocation2 + $0x10] sm:$0xf] %vm262_vm5, %v527_v62 }
 0x359   : > { %v534_v63 = vpop.permute.xlu1 %533 }
 0x35a   : > { %544 = vst.msk [vmem:[#allocation2] sm:$0xff] %vm276_vm4, %v534_v63 }
 0x361   : > { %v542_v0 = vpop.permute.xlu1 %541  ;;  %v547_v2 = vld [vmem:[#allocation2] sm:$0xff] }
 0x362   : > { %v551_v4 = vld [vmem:[#allocation2 + $0x1] sm:$0xff]  ;;  %546 = vst.msk [vmem:[#allocation2 + $0x10] sm:$0xf] %vm279_vm6, %v542_v0  ;;  %v549_v6 = vmul.f32 0.05, %v547_v2 }
 0x363   : > { %v557_v7 = vld [vmem:[#allocation2 + $0x2] sm:$0xff]  ;;  %v553_v8 = vmul.f32 0.25, %v551_v4 }
 0x364   : > { %v563_v9 = vld [vmem:[#allocation2 + $0x3] sm:$0xff]  ;;  %v559_v11 = vmul.f32 0.4, %v557_v7 }
 0x365   : > { %v555_v10 = vadd.f32 %v553_v8, %v549_v6  ;;  %v569_v12 = vld [vmem:[#allocation2 + $0x4] sm:$0xff]  ;;  %v565_v15 = vmul.f32 0.25, %v563_v9 }
 0x366   : > { %v571_v18 = vmul.f32 0.05, %v569_v12 }
 0x367   : > { %v561_v14 = vadd.f32 %v559_v11, %v555_v10 }
 0x369   : > { %v567_v17 = vadd.f32 %v565_v15, %v561_v14  ;;  %v552_v19 = vld [vmem:[#allocation2 + $0x9] sm:$0xff]  ;;  %v420_v14 = vmul.f32 0.25, %v1360_v50  ;;  %v416_v15 = vmul.f32 0.05, %v1352_v46  ;;  %v425_v50 = vmul.f32 0.4, %v1354_v47 }
 0x36a   : > { %v558_v20 = vld [vmem:[#allocation2 + $0xa] sm:$0xff]  ;;  %v554_v24 = vmul.f32 0.25, %v552_v19  ;;  %v415_v19 = vmul.f32 0.05, %v1347_v44  ;;  %v432_v46 = vmul.f32 0.25, %v1364_v52 }
 0x36b   : > { %v573_v22 = vadd.f32 %v571_v18, %v567_v17  ;;  %v564_v26 = vld [vmem:[#allocation2 + $0xb] sm:$0xff]  ;;  %v560_v30 = vmul.f32 0.4, %v558_v20  ;;  %v422_v18 = vadd.f32 %v420_v14, %v416_v15  ;;  %v438_v44 = vmul.f32 0.05, %v1366_v55 }
 0x36c   : > { %v556_v29 = vadd.f32 %v554_v24, %v550_v23  ;;  %v570_v31 = vld [vmem:[#allocation2 + $0xc] sm:$0xff]  ;;  %v566_v34 = vmul.f32 0.25, %v564_v26  ;;  %v437_v47 = vmul.f32 0.05, %v1358_v49 }
 0x36d   : > { %v589_v27 = vmul.f32 0.4, %v573_v22  ;;  %v577_v28 = vmul.f32 0.25, %v573_v22  ;;  %v572_v36 = vmul.f32 0.05, %v570_v31 }
 0x36e   : > { %v562_v32 = vadd.f32 %v560_v30, %v556_v29  ;;  %v575_v40 = vmul.f32 0.05, %v573_v22  ;;  %v426_v22 = vmul.f32 0.4, %v1362_v51 }
 0x36f   : > { %593 = vrot.lane.b32.xlu1 %v589_v27, %s1125_s19  ;;  %581 = vrot.lane.b32.xlu2 %v577_v28, %s1126_s15 }
 0x370   : > { %v568_v35 = vadd.f32 %v566_v34, %v562_v32  ;;  %v428_v24 = vadd.f32 %v426_v22, %v422_v18 }
 0x372   : > { %v574_v37 = vadd.f32 %v572_v36, %v568_v35  ;;  %v434_v27 = vadd.f32 %v432_v46, %v428_v24 }
 0x374   : > { %v590_v38 = vmul.f32 0.4, %v574_v37  ;;  %v578_v39 = vmul.f32 0.25, %v574_v37  ;;  %v576_v41 = vmul.f32 0.05, %v574_v37  ;;  %v1410_v51 = vadd.f32 %v438_v44, %v434_v27 }
 0x376   : > { %583 = vrot.lane.b32.xlu0 %v578_v39, %s1126_s15  ;;  %v444_v30 = vmul.f32 0.25, %v1410_v51  ;;  %v456_v49 = vmul.f32 0.4, %v1410_v51 }
 0x377   : > { %595 = vrot.lane.b32.xlu2 %v590_v38, %s1125_s19  ;;  %603 = vrot.lane.b32.xlu1 %v578_v39, %s1127_s16 }
 0x37e   : > { %601 = vrot.lane.b32.xlu0 %v577_v28, %s1127_s16  ;;  %v431_v28 = vmul.f32 0.25, %v1356_v48 }
 0x37f   : > { %611 = vrot.lane.b32.xlu2 %v575_v40, %s1128_s24 }
 0x386   : > { %613 = vrot.lane.b32.xlu0 %v576_v41, %s1128_s24 }
 0x3c9   : > { %v582_v42 = vpop.permute.xlu2 %581 }
 0x3ca   : > { %v587_v56 = vadd.f32 %v582_v42, %v575_v40 }
 0x3d1   : > { %v596_v43 = vpop.permute.xlu2 %595 }
 0x3d9   : > { %v612_v61 = vpop.permute.xlu2 %611 }
 0x3e1   : > { %v594_v54 = vpop.permute.xlu1 %593 }
 0x3e2   : > { %v599_v57 = vadd.f32 %v594_v54, %v587_v56 }
 0x3e8   : > { %v584_v53 = vpop.permute.xlu0 %583 }
 0x3e9   : > { %v588_v58 = vadd.f32 %v584_v53, %v576_v41  ;;  %v604_v2 = vpop.permute.xlu1 %603 }
 0x3eb   : > { %v600_v62 = vadd.f32 %v596_v43, %v588_v58 }
 0x3ed   : > { %v608_v4 = vadd.f32 %v604_v2, %v600_v62 }
 0x3f0   : > { %v602_v59 = vpop.permute.xlu0 %601 }
 0x3f1   : > { %v607_v60 = vadd.f32 %v602_v59, %v599_v57 }
 0x3f3   : > { %v617_v63 = vadd.f32 %v612_v61, %v607_v60 }
 0x3f5   : > { %v619_v0 = vmul.f32 %v617_v63, %v1305_v13 }
 0x3f7   : > { %623 = vrot.lane.b32.xlu1 %v619_v0, %s1122_s29  ;;  %v631_v7 = vperm.slane %v619_v0, 0 }
 0x3f8   : > { %v614_v6 = vpop.permute.xlu0 %613 }
 0x3f9   : > { %v618_v8 = vadd.f32 %v614_v6, %v608_v4  ;;  %633 = vrot.lane.b32.xlu0 %v631_v7, %s1122_s29 }
 0x3fb   : > { %v620_v9 = vmul.f32 %v618_v8, %v1311_v21  ;;  %v419_v21 = vmul.f32 0.25, %v1349_v45 }
 0x3fd   : > { %625 = vrot.lane.b32.xlu2 %v620_v9, %s1122_s29  ;;  %v637_v10 = vperm.slane %v620_v9, 7  ;;  %v421_v23 = vadd.f32 %v419_v21, %v415_v19  ;;  %v442_v19 = vmul.f32 0.05, %v1410_v51 }
 0x3ff   : > { %639 = vrot.lane.b32.xlu1 %v637_v10, %s1122_s29  ;;  %v427_v26 = vadd.f32 %v425_v50, %v421_v23 }
 0x401   : > { %v433_v29 = vadd.f32 %v431_v28, %v427_v26 }
 0x403   : > { %v439_v52 = vadd.f32 %v437_v47, %v433_v29 }
 0x405   : > { %v443_v48 = vmul.f32 0.25, %v439_v52  ;;  %v1417_v55 = vmul.f32 0.05, %v439_v52  ;;  %v455_v31 = vmul.f32 0.4, %v439_v52 }
 0x457   : > { %v626_v11 = vpop.permute.xlu2 %625 }
 0x458   : > { %630 = vst.msk [vmem:[#allocation2 + $0xa] sm:$0xff] %vm225_vm1, %v626_v11 }
 0x469   : > { %v624_v13 = vpop.permute.xlu1 %623 }
 0x46a   : > { %629 = vst.msk [vmem:[#allocation2 + $0x2] sm:$0xff] %vm225_vm1, %v624_v13  ;;  %vm799_vm1 = vcmask 0  }
 0x46b   : > { %v634_v12 = vpop.permute.xlu0 %633 }
 0x46c   : > { %636 = vst.msk [vmem:[#allocation2] sm:$0x3] %vm233_vm2, %v634_v12 }
 0x471   : > { %v640_v16 = vpop.permute.xlu1 %639  ;;  %v644_v17 = vld [vmem:[#allocation2 + $0x8] sm:$0xff] }
 0x472   : > { %642 = vst.msk [vmem:[#allocation2 + $0x12] sm:$0x3] %vm233_vm2, %v640_v16  ;;  %653 = vperm.xlu0 %975, %v644_v17  }
 0x473   : > { %v643_v20 = vld [vmem:[#allocation2] sm:$0xff] }
 0x474   : > { %648 = vperm.xlu2 %978, %v643_v20  }
 0x479   : > { %v645_v45 = vld [vmem:[#allocation2 + $0x10] sm:$0xf] }
 0x47a   : > { %981 = vset.pattern.permute.xlu0 %v1123_v5  ;;  %658 = vperm.xlu1 %979, %v645_v45  }
 0x47b   : > { %669 = vperm.xlu0 %981, %v644_v17  }
 0x47c   : > { %980 = vset.pattern.permute.xlu2 %v1123_v5 }
 0x47d   : > { %665 = vperm.xlu2 %980, %v643_v20  }
 0x482   : > { %982 = vset.pattern.permute.xlu1 %v1123_v5 }
 0x483   : > { %469 = vrot.lane.b32.xlu0 %v444_v30, %s1127_s16  ;;  %673 = vperm.xlu1 %982, %v645_v45  }
 0x485   : > { %447 = vrot.lane.b32.xlu2 %v443_v48, %s1126_s15 }
 0x48b   : > { %477 = vrot.lane.b32.xlu0 %v1417_v55, %s1128_s24  ;;  %449 = vrot.lane.b32.xlu1 %v444_v30, %s1126_s15 }
 0x48d   : > { %461 = vrot.lane.b32.xlu2 %v456_v49, %s1125_s19 }
 0x493   : > { %459 = vrot.lane.b32.xlu1 %v455_v31, %s1125_s19 }
 0x495   : > { %467 = vrot.lane.b32.xlu2 %v443_v48, %s1127_s16 }
 0x4ce   : > { %v649_v5 = vpop.permute.xlu2 %648 }
 0x4cf   : > { %661 = vst.msk [vmem:[#allocation2] sm:$0xff] %vm259_vm3, %v649_v5 }
 0x4d7   : > { %v666_v32 = vpop.permute.xlu2 %665 }
 0x4d8   : > { %676 = vst.msk [vmem:[#allocation2] sm:$0xff] %vm276_vm4, %v666_v32 }
 0x4df   : > { %v679_v37 = vld [vmem:[#allocation2] sm:$0xff]  ;;  %v448_v22 = vpop.permute.xlu2 %447 }
 0x4e0   : > { %v681_v41 = vmul.f32 0.05, %v679_v37  ;;  %v453_v29 = vadd.f32 %v448_v22, %v1417_v55 }
 0x4e4   : > { %v654_v34 = vpop.permute.xlu0 %653 }
 0x4e5   : > { %662 = vst.msk [vmem:[#allocation2 + $0x8] sm:$0xff] %vm259_vm3, %v654_v34 }
 0x4e7   : > { %v462_v23 = vpop.permute.xlu2 %461 }
 0x4ec   : > { %v659_v35 = vpop.permute.xlu1 %658 }
 0x4ed   : > { %663 = vst.msk [vmem:[#allocation2 + $0x10] sm:$0xf] %vm262_vm5, %v659_v35  ;;  %v670_v36 = vpop.permute.xlu0 %669 }
 0x4ee   : > { %677 = vst.msk [vmem:[#allocation2 + $0x8] sm:$0xff] %vm276_vm4, %v670_v36 }
 0x4ef   : > { %v468_v46 = vpop.permute.xlu2 %467 }
 0x4f5   : > { %v674_v38 = vpop.permute.xlu1 %673  ;;  %v683_v39 = vld [vmem:[#allocation2 + $0x1] sm:$0xff]  ;;  %v470_v50 = vpop.permute.xlu0 %469 }
 0x4f6   : > { %v689_v40 = vld [vmem:[#allocation2 + $0x2] sm:$0xff]  ;;  %678 = vst.msk [vmem:[#allocation2 + $0x10] sm:$0xf] %vm279_vm6, %v674_v38  ;;  %v685_v42 = vmul.f32 0.25, %v683_v39 }
 0x4f7   : > { %v695_v43 = vld [vmem:[#allocation2 + $0x3] sm:$0xff]  ;;  %v691_v54 = vmul.f32 0.4, %v689_v40 }
 0x4f8   : > { %v687_v53 = vadd.f32 %v685_v42, %v681_v41  ;;  %v701_v56 = vld [vmem:[#allocation2 + $0x4] sm:$0xff]  ;;  %v697_v58 = vmul.f32 0.25, %v695_v43 }
 0x4f9   : > { %v680_v59 = vld [vmem:[#allocation2 + $0x8] sm:$0xff]  ;;  %v703_v61 = vmul.f32 0.05, %v701_v56 }
 0x4fa   : > { %v693_v57 = vadd.f32 %v691_v54, %v687_v53  ;;  %v682_v2 = vmul.f32 0.05, %v680_v59 }
 0x4fc   : > { %v699_v60 = vadd.f32 %v697_v58, %v693_v57 }
 0x4fd   : > { %v684_v62 = vld [vmem:[#allocation2 + $0x9] sm:$0xff]  ;;  %v450_v24 = vpop.permute.xlu1 %449  ;;  %v478_v45 = vpop.permute.xlu0 %477 }
 0x4fe   : > { %v690_v63 = vld [vmem:[#allocation2 + $0xa] sm:$0xff]  ;;  %v705_v0 = vadd.f32 %v703_v61, %v699_v60  ;;  %v686_v4 = vmul.f32 0.25, %v684_v62  ;;  %v454_v51 = vadd.f32 %v450_v24, %v442_v19 }
 0x4ff   : > { %v696_v7 = vld [vmem:[#allocation2 + $0xb] sm:$0xff]  ;;  %v692_v9 = vmul.f32 0.4, %v690_v63 }
 0x500   : > { %v709_v6 = vmul.f32 0.25, %v705_v0  ;;  %v688_v8 = vadd.f32 %v686_v4, %v682_v2  ;;  %v702_v10 = vld [vmem:[#allocation2 + $0xc] sm:$0xff]  ;;  %v698_v13 = vmul.f32 0.25, %v696_v7  ;;  %v707_v17 = vmul.f32 0.05, %v705_v0 }
 0x501   : > { %v704_v14 = vmul.f32 0.05, %v702_v10  ;;  %v721_v18 = vmul.f32 0.4, %v705_v0  ;;  %v466_v34 = vadd.f32 %v462_v23, %v454_v51 }
 0x502   : > { %713 = vrot.lane.b32.xlu2 %v709_v6, %s1126_s15  ;;  %v694_v11 = vadd.f32 %v692_v9, %v688_v8 }
 0x503   : > { %v474_v40 = vadd.f32 %v470_v50, %v466_v34 }
 0x504   : > { %v700_v12 = vadd.f32 %v698_v13, %v694_v11 }
 0x505   : > { %v460_v26 = vpop.permute.xlu1 %459 }
 0x506   : > { %v706_v15 = vadd.f32 %v704_v14, %v700_v12  ;;  %v465_v52 = vadd.f32 %v460_v26, %v453_v29 }
 0x508   : > { %v722_v21 = vmul.f32 0.4, %v706_v15  ;;  %v710_v16 = vmul.f32 0.25, %v706_v15  ;;  %v708_v20 = vmul.f32 0.05, %v706_v15  ;;  %v473_v30 = vadd.f32 %v468_v46, %v465_v52 }
 0x50a   : > { %727 = vrot.lane.b32.xlu1 %v722_v21, %s1125_s19  ;;  %735 = vrot.lane.b32.xlu2 %v710_v16, %s1127_s16  ;;  %v483_v35 = vadd.f32 %v478_v45, %v473_v30 }
 0x50b   : > { %715 = vrot.lane.b32.xlu0 %v710_v16, %s1126_s15 }
 0x50c   : > { %v485_v41 = vsub.f32 %v1263_v1, %v483_v35 }
 0x512   : > { %733 = vrot.lane.b32.xlu1 %v709_v6, %s1127_s16  ;;  %743 = vrot.lane.b32.xlu2 %v707_v17, %s1128_s24 }
 0x513   : > { %725 = vrot.lane.b32.xlu0 %v721_v18, %s1125_s19 }
 0x51a   : > { %479 = vrot.lane.b32.xlu1 %v442_v19, %s1128_s24 }
 0x51b   : > { %745 = vrot.lane.b32.xlu0 %v708_v20, %s1128_s24 }
 0x55c   : > { %v714_v27 = vpop.permute.xlu2 %713 }
 0x55d   : > { %v719_v48 = vadd.f32 %v714_v27, %v707_v17 }
 0x564   : > { %v736_v47 = vpop.permute.xlu2 %735 }
 0x56c   : > { %v744_v38 = vpop.permute.xlu2 %743 }
 0x57c   : > { %v728_v28 = vpop.permute.xlu1 %727 }
 0x57d   : > { %v716_v44 = vpop.permute.xlu0 %715 }
 0x57e   : > { %v720_v49 = vadd.f32 %v716_v44, %v708_v20 }
 0x580   : > { %v732_v36 = vadd.f32 %v728_v28, %v720_v49  ;;  %v790_v28 = vld [vmem:[#allocation8] sm:$0x1] }
 0x582   : > { %v740_v42 = vadd.f32 %v736_v47, %v732_v36 }
 0x584   : > { %v734_v31 = vpop.permute.xlu1 %733 }
 0x585   : > { %v726_v5 = vpop.permute.xlu0 %725 }
 0x586   : > { %v731_v32 = vadd.f32 %v726_v5, %v719_v48 }
 0x588   : > { %v739_v37 = vadd.f32 %v734_v31, %v731_v32 }
 0x58a   : > { %v749_v39 = vadd.f32 %v744_v38, %v739_v37 }
 0x58c   : > { %v751_v55 = vsub.f32 %v1318_v25, %v749_v39  ;;  %v480_v43 = vpop.permute.xlu1 %479 }
 0x58d   : > { %v746_v53 = vpop.permute.xlu0 %745  ;;  %v484_v54 = vadd.f32 %v480_v43, %v474_v40 }
 0x58e   : > { %v753_v56 = vsub.f32 %v485_v41, %v751_v55  ;;  %v750_v57 = vadd.f32 %v746_v53, %v740_v42 }
 0x58f   : > { %v486_v58 = vsub.f32 %v1269_v3, %v484_v54 }
 0x590   : > { %v755_v59 = vmul.f32 %v753_v56, %v753_v56  ;;  %v752_v60 = vsub.f32 %v1329_v33, %v750_v57 }
 0x592   : > { %v757_v61 = vadd.f32 1e-06, %v755_v59  ;;  %v754_v62 = vsub.f32 %v486_v58, %v752_v60 }
 0x594   : > { %v756_v63 = vmul.f32 %v754_v62, %v754_v62  ;;  %983 = vrsqrt.f32 %v757_v61  ;;  %vm766_vm12 = vcmp.eq.f32.partialorder %v757_v61, inf  ;;  %v769_v33 = vand.u32 2147483648, %v757_v61 }
 0x595   : > { %vm768_vm14 = vcmp.eq.f32.partialorder %v757_v61, 0.0 }
 0x596   : > { %v758_v0 = vadd.f32 1e-06, %v756_v63 }
 0x598   : > { %985 = vrsqrt.f32 %v758_v0  ;;  %vm778_vm15 = vcmp.eq.f32.partialorder %v758_v0, inf  ;;  %v781_v17 = vand.u32 2147483648, %v758_v0  ;;  %vm780_vm0 = vcmp.eq.f32.partialorder %v758_v0, 0.0 }
 0x59a   : > { %v984_v1 = vpop.eup %983 }
 0x59b   : > { %v760_v2 = vmul.f32 %v984_v1, %v757_v61 }
 0x59d   : > { %v761_v25 = vmul.f32 %v984_v1, %v760_v2 }
 0x59e   : > { %v986_v4 = vpop.eup %985 }
 0x59f   : > { %v762_v7 = vmul.f32 0.5, %v761_v25  ;;  %v772_v6 = vmul.f32 %v986_v4, %v758_v0 }
 0x5a1   : > { %v763_v8 = vsub.f32 1.5, %v762_v7  ;;  %v773_v9 = vmul.f32 %v986_v4, %v772_v6 }
 0x5a3   : > { %v764_v10 = vmul.f32 %v984_v1, %v763_v8  ;;  %v774_v11 = vmul.f32 0.5, %v773_v9 }
 0x5a5   : > { %v765_v3 = vmul.f32 %v764_v10, %v757_v61  ;;  %v775_v13 = vsub.f32 1.5, %v774_v11 }
 0x5a7   : > { %v767_v12 = vsel %vm766_vm12, %v757_v61, %v765_v3  ;;  %v776_v14 = vmul.f32 %v986_v4, %v775_v13 }
 0x5a8   : > { %v770_v15 = vsel %vm768_vm14, %v769_v33, %v767_v12 }
 0x5a9   : > { %v784_v21 = vsel %vm783_vm13, %v770_v15, 0.0  ;;  %v777_v16 = vmul.f32 %v776_v14, %v758_v0 }
 0x5aa   : > { %785 = vadd.xlane.f32.xlu1 %v784_v21 }
 0x5ab   : > { %v779_v18 = vsel %vm778_vm15, %v758_v0, %v777_v16 }
 0x5ac   : > { %v782_v19 = vsel %vm780_vm0, %v781_v17, %v779_v18 }
 0x5ad   : > { %v787_v20 = vsel %vm783_vm13, %v782_v19, 0.0 }
 0x5ae   : > { %788 = vadd.xlane.f32.xlu2 %v787_v20 }
 0x61d   : > { %v786_v22 = vpop.xlane.xlu1 %785 }
 0x621   : > { %v789_v23 = vpop.xlane.xlu2 %788 }
 0x622   : > { %v791_v24 = vadd.f32 %v789_v23, %v786_v22 }
 0x624   : > { %v792_v50 = vrot.slane %v791_v24, 4 }
 0x626   : > { %v793_v46 = vadd.f32 %v792_v50, %v791_v24 }
 0x628   : > { %v794_v26 = vrot.slane %v793_v46, 2 }
 0x62a   : > { %v795_v45 = vadd.f32 %v794_v26, %v793_v46 }
 0x62c   : > { %v796_v27 = vrot.slane %v795_v45, 1 }
 0x62e   : > { %v797_v44 = vadd.f32 %v796_v27, %v795_v45 }
 0x630   : > { %v798_v29 = vadd.f32 %v797_v44, %v790_v28 }
 0x632   : > { %800 = vst.msk [vmem:[#allocation8] sm:$0x1] %vm799_vm1, %v798_v29 }
 0x633   : > { %907 = dma.vmem_to_hbm [thread:$0]  (%p918_p7), %s808_s26, 16, %s810_s5, [#allocation5]  }
 0x634   : > { %1100 = dma.done.wait (%p918_p7), [#allocation5], 16  }
 0x635   : > { %1102 = vsyncadd (%p918_p7), [#allocation5], 4294967280 }
 0x636 PF: > { %p16_p11 = scmp.ge.s32.totalorder %s1168_s14, 8   ;;  %s1473_s9 = smov %s1109_s10 }
 0x637   : > { %s1474_s10 = smov %s1113_s11  ;;  %s1475_s11 = smov %s1178_s17 }
 0x638   : > { %s1476_s12 = smov %s1168_s14  ;;  %18 = sbr.rel (!%p16_p11) target bundleno = 6 (0x6), region = 82 }
 0x63d   :  { %823 = vsyncpa [#allocation4], 1 }
 0x63e   :  { %825 = vsyncpa [#allocation4 + $0x1], 1 }
 0x63f   :  { %826 = vsyncpa [#allocation7], 1 }
 0x640   :  { %828 = vsyncpa [#allocation7 + $0x1], 1 }
 0x641   :  { %829 = vsyncpa [#allocation5], 1 }
 0x642   :  { %831 = vsyncpa [#allocation5 + $0x1], 1 }

</bundles_post_ra>
